<compile_context>
chip_gen: v6e
topology: v6e:2x2x1
jax: 0.10.0
libtpu: 0.0.40
codegen_flags: <defaults>
</compile_context>

<pallas_src>
import math

import jax
import jax.numpy as jnp
from jax.experimental import pallas as pl
from jax.experimental.pallas import tpu as pltpu


N_CLASSES_PAD = 128   # lane-dense class axis; true classes sliced in wrapper
K_PAD = 128           # lane-dense im2col contraction axis (9*C zero-padded)
BT_CAP = 64           # per-step batch-tile cap (sized for v7x's 64 MiB VMEM)


def _round_up(x, m):
    return -(-x // m) * m


# ----------------------------------------------------------------------------
# Pallas kernel: fused conv (single K-padded dot) + bias + ReLU +
#                MXU average-pool + linear head for a tile of bt images.
# ----------------------------------------------------------------------------
def classifier_kernel(patch_ref, pool_ref, wc_ref, bc_ref, wh_ref, bh_ref, out_ref):
    # patch_ref: (bt, HW, K_PAD)        bf16  -- pre-packed im2col patches
    # pool_ref:  (bt, bt*HW)            bf16  -- block-diagonal 1/HW pool matrix
    # wc_ref:    (K_PAD, HID)           bf16  -- conv weight, K zero-padded
    # bc_ref:    (1, HID)               f32   -- conv bias
    # wh_ref:    (HID, N_CLASSES_PAD)   bf16  -- fc weight, classes zero-padded
    # bh_ref:    (1, N_CLASSES_PAD)     f32   -- fc bias, zero-padded
    # out_ref:   (bt, N_CLASSES_PAD)    f32   -- lane-dense logits for this tile
    bt, hw, kpad = patch_ref.shape

    # Single K=128 MXU dot over the packed patches (replaces nine K=4 taps and
    # the scratch-accumulator stores/loads of the previous version).
    x = patch_ref[...].reshape(bt * hw, kpad)                       # leading merge
    conv = jnp.dot(x, wc_ref[...], preferred_element_type=jnp.float32)

    # bias + ReLU on the VPU (f32)
    h = jnp.maximum(conv + bc_ref[...], 0.0)                        # (bt*hw, HID)

    # Global average pool folded into the MXU: block-diagonal 1/HW matrix
    # picks each image's rows (avoids the XLU reshape + mean reduce).
    pooled = jnp.dot(pool_ref[...], h.astype(jnp.bfloat16),
                     preferred_element_type=jnp.float32)            # (bt, HID)

    # Classifier head: bf16 operands, f32 accumulate, lane-dense output.
    logits = jnp.dot(pooled.astype(jnp.bfloat16), wh_ref[...],
                     preferred_element_type=jnp.float32) + bh_ref[...]
    out_ref[...] = logits                                            # (bt, 128)


# ----------------------------------------------------------------------------
# Parameter init (mirrors ImageClassifier._init_weights for this backbone)
# ----------------------------------------------------------------------------
def _xavier_uniform(key, shape, fan_in, fan_out):
    bound = math.sqrt(6.0 / (fan_in + fan_out))
    return jax.random.uniform(key, shape, jnp.float32, -bound, bound)


def init_params(key, c_in, hidden, n_classes):
    assert 9 * c_in <= K_PAD, "9*C must fit in the padded K=128 patch axis"
    k_conv, k_fc = jax.random.split(key)

    # Conv2d(c_in, hidden, 3, padding=1, bias=True): xavier_uniform / zeros.
    w_conv_oihw = _xavier_uniform(k_conv, (hidden, c_in, 3, 3),
                                  fan_in=c_in * 9, fan_out=hidden * 9)
    # (out,in,kh,kw) -> (kh,kw,in,out) -> (9*C, HID); row order matches the
    # wrapper's tap order (dh-major, dw, channel).  Zero-pad K to 128.
    w_conv = jnp.transpose(w_conv_oihw, (2, 3, 1, 0)).reshape(9 * c_in, hidden)
    w_conv = jnp.pad(w_conv, ((0, K_PAD - 9 * c_in), (0, 0))).astype(jnp.bfloat16)
    b_conv = jnp.zeros((1, hidden), jnp.float32)

    # Linear 'fc' (not 'head*'): xavier_uniform weight, zero bias; classes
    # zero-padded to a lane-dense 128-wide output.  Stored bf16 (MXU operand).
    w_fc_oi = _xavier_uniform(k_fc, (n_classes, hidden),
                              fan_in=hidden, fan_out=n_classes)
    w_fc = jnp.zeros((hidden, N_CLASSES_PAD), jnp.float32)
    w_fc = w_fc.at[:, :n_classes].set(jnp.transpose(w_fc_oi, (1, 0)))
    b_fc = jnp.zeros((1, N_CLASSES_PAD), jnp.float32)

    return dict(w_conv=w_conv, b_conv=b_conv,
                w_fc=w_fc.astype(jnp.bfloat16), b_fc=b_fc,
                num_classes=n_classes)


# ----------------------------------------------------------------------------
# Wrapper helpers
# ----------------------------------------------------------------------------
def _im2col_patches(image_nchw, k_pad):
    """NCHW f32 image -> (B, H*W, k_pad) bf16 patches for a 3x3 / pad=1 conv."""
    B, C, H, W = image_nchw.shape
    x = jnp.transpose(image_nchw.astype(jnp.bfloat16), (0, 2, 3, 1))     # NHWC
    xp = jnp.pad(x, ((0, 0), (1, 1), (1, 1), (0, 0)))
    taps = [xp[:, dh:dh + H, dw:dw + W, :]
            for dh in range(3) for dw in range(3)]
    patches = jnp.concatenate(taps, axis=-1).reshape(B, H * W, 9 * C)
    return jnp.pad(patches, ((0, 0), (0, 0), (0, k_pad - 9 * C)))


def _num_tensorcores():
    # v7x has 2 TensorCores per chip; v5e/v6e have 1.  Defensive query; fall
    # back to 1 (single-step grid preferred) if the field is unavailable.
    try:
        info = pltpu.get_tpu_info()
        for attr in ("num_cores", "core_count", "num_tensorcores",
                     "tensorcore_count"):
            v = getattr(info, attr, None)
            if isinstance(v, int) and v > 0:
                return v
    except Exception:
        pass
    return 1


# ----------------------------------------------------------------------------
# Forward wrapper: layout prep + pallas_call
# ----------------------------------------------------------------------------
def image_classifier_forward(image_nchw, params, targets=None):
    """Matches ImageClassifier.forward: returns (outputs, 0, {}) when
    targets is None."""
    B, C, H, W = image_nchw.shape
    HID = params["b_conv"].shape[1]
    NCLS = params["num_classes"]
    HW = H * W

    # im2col in the wrapper (the raw image is tiny): lane-dense bf16 patches.
    patches = _im2col_patches(image_nchw, K_PAD)                     # (B, HW, 128)

    # Batch tiling: bt is a multiple of 8 (sublane-aligned, unmasked stores),
    # capped for v7x's 64 MiB VMEM; only split into several grid steps when
    # there is >1 TensorCore (or the batch exceeds the cap).
    b8 = _round_up(B, 8)
    bt = min(BT_CAP, b8)
    n_tc = _num_tensorcores()
    if n_tc > 1 and b8 // bt < n_tc and b8 >= 16:
        bt = max(8, _round_up(-(-b8 // n_tc), 8))
    nb = -(-b8 // bt)
    b_pad = nb * bt
    if b_pad != B:
        patches = jnp.pad(patches, ((0, b_pad - B), (0, 0), (0, 0)))

    # Block-diagonal average-pool operator (pool folded into the MXU).
    row = jnp.arange(bt, dtype=jnp.int32)[:, None]
    col = jnp.arange(bt * HW, dtype=jnp.int32)[None, :]
    pool_mat = jnp.where(col // HW == row, 1.0 / HW, 0.0).astype(jnp.bfloat16)

    flops = (2 * b_pad * HW * K_PAD * HID
             + 2 * nb * bt * (bt * HW) * HID
             + 2 * b_pad * HID * N_CLASSES_PAD)
    bytes_accessed = (patches.size * 2 + pool_mat.size * 2
                      + params["w_conv"].size * 2 + params["b_conv"].size * 4
                      + params["w_fc"].size * 2 + params["b_fc"].size * 4
                      + b_pad * N_CLASSES_PAD * 4)

    out = pl.pallas_call(
        classifier_kernel,
        out_shape=jax.ShapeDtypeStruct((b_pad, N_CLASSES_PAD), jnp.float32),
        grid=(nb,),
        in_specs=[
            pl.BlockSpec((bt, HW, K_PAD), lambda i: (i, 0, 0)),
            pl.BlockSpec((bt, bt * HW), lambda i: (0, 0)),
            pl.BlockSpec((K_PAD, HID), lambda i: (0, 0)),
            pl.BlockSpec((1, HID), lambda i: (0, 0)),
            pl.BlockSpec((HID, N_CLASSES_PAD), lambda i: (0, 0)),
            pl.BlockSpec((1, N_CLASSES_PAD), lambda i: (0, 0)),
        ],
        out_specs=pl.BlockSpec((bt, N_CLASSES_PAD), lambda i: (i, 0)),
        compiler_params=pltpu.CompilerParams(
            dimension_semantics=("parallel",),
            vmem_limit_bytes=32 * 1024 * 1024),
        cost_estimate=pl.CostEstimate(
            flops=flops, transcendentals=0, bytes_accessed=bytes_accessed),
    )(patches, pool_mat, params["w_conv"], params["b_conv"],
      params["w_fc"], params["b_fc"])

    logits = out[:B, :NCLS]                                          # (B, NCLS)

    if targets is not None:
        # TODO(synk): training path (CrossEntropyLoss + sklearn f1/accuracy in
        # monitor_metrics) is host-side and not a Pallas-expressible hot path.
        return logits, 0, {}
    return logits, 0, {}


# Pure-JAX reference of the same backbone (mirrors the kernel's bf16 operand
# rounding and f32 accumulation; sanity check only).
def _reference_forward(image_nchw, params):
    B, C, H, W = image_nchw.shape
    patches = _im2col_patches(image_nchw, K_PAD).astype(jnp.float32)
    x = patches.reshape(B * H * W, K_PAD)
    h = jnp.maximum(x @ params["w_conv"].astype(jnp.float32)
                    + params["b_conv"][0], 0.0)
    h = h.reshape(B, H * W, -1).astype(jnp.bfloat16).astype(jnp.float32)
    pooled = jnp.mean(h, axis=1).astype(jnp.bfloat16).astype(jnp.float32)
    logits = pooled @ params["w_fc"].astype(jnp.float32) + params["b_fc"][0]
    return logits[:, :params["num_classes"]]


if __name__ == "__main__":
    key = jax.random.PRNGKey(0)
    k_img, k_params = jax.random.split(key)

    B, C, H, W = 2, 4, 16, 16      # small NCHW input consistent with the model
    HIDDEN, N_CLASSES = 32, 10     # SVHN has 10 classes

    image = jax.random.normal(k_img, (B, C, H, W), jnp.float32)
    params = init_params(k_params, C, HIDDEN, N_CLASSES)

    logits, loss, metrics_dict = image_classifier_forward(image, params)
    logits = jax.block_until_ready(logits)

    ref = _reference_forward(image, params)
    assert logits.shape == (B, N_CLASSES)
    assert jnp.allclose(logits, ref, atol=1e-2, rtol=1e-2), "mismatch vs reference"
    assert loss == 0 and metrics_dict == {}

    print("KERNEL_OK")
</pallas_src>

<mosaic_0001>
module attributes {stable_mosaic.version = 11 : i64} {
  func.func @classifier_kernel(%arg0: i32, %arg1: memref<8x256x128xbf16, #tpu.memory_space<vmem>>, %arg2: memref<8x2048xbf16, #tpu.memory_space<vmem>>, %arg3: memref<128x32xbf16, #tpu.memory_space<vmem>>, %arg4: memref<1x32xf32, #tpu.memory_space<vmem>>, %arg5: memref<32x128xbf16, #tpu.memory_space<vmem>>, %arg6: memref<1x128xf32, #tpu.memory_space<vmem>>, %arg7: memref<8x128xf32, #tpu.memory_space<vmem>>) attributes {dimension_semantics = [#tpu.dimension_semantics<parallel>], iteration_bounds = array<i64: 1>, scalar_prefetch = 0 : i64, scratch_operands = 0 : i64, tpu.core_type = #tpu.core_type<tc>, window_params = [{transform_indices = @transform_0, window_bounds = array<i64: 8, 256, 128>}, {pipeline_mode = #tpu.pipeline_mode<synchronous>, transform_indices = @transform_1, window_bounds = array<i64: 8, 2048>}, {pipeline_mode = #tpu.pipeline_mode<synchronous>, transform_indices = @transform_2, window_bounds = array<i64: 128, 32>}, {pipeline_mode = #tpu.pipeline_mode<synchronous>, transform_indices = @transform_3, window_bounds = array<i64: 1, 32>}, {pipeline_mode = #tpu.pipeline_mode<synchronous>, transform_indices = @transform_4, window_bounds = array<i64: 32, 128>}, {pipeline_mode = #tpu.pipeline_mode<synchronous>, transform_indices = @transform_5, window_bounds = array<i64: 1, 128>}, {transform_indices = @transform_6, window_bounds = array<i64: 8, 128>}]} {
    %c0 = arith.constant 0 : index
    %c0_0 = arith.constant 0 : index
    %c0_1 = arith.constant 0 : index
    %0 = vector.load %arg1[%c0, %c0_0, %c0_1] : memref<8x256x128xbf16, #tpu.memory_space<vmem>>, vector<8x256x128xbf16>
    %1 = vector.shape_cast %0 : vector<8x256x128xbf16> to vector<2048x128xbf16>
    %c0_2 = arith.constant 0 : index
    %c0_3 = arith.constant 0 : index
    %2 = vector.load %arg3[%c0_2, %c0_3] : memref<128x32xbf16, #tpu.memory_space<vmem>>, vector<128x32xbf16>
    %cst = arith.constant dense<0.000000e+00> : vector<2048x32xf32>
    %3 = tpu.matmul %1, %2, %cst {dimension_numbers = #tpu.dot_dimension_numbers<[1], [0], [0], [1], [0, 0, 1, 1], [], []>} : vector<2048x128xbf16>, vector<128x32xbf16>, vector<2048x32xf32> -> vector<2048x32xf32>
    %c0_4 = arith.constant 0 : index
    %c0_5 = arith.constant 0 : index
    %4 = vector.load %arg4[%c0_4, %c0_5] : memref<1x32xf32, #tpu.memory_space<vmem>>, vector<1x32xf32>
    %5 = vector.broadcast %4 : vector<1x32xf32> to vector<2048x32xf32>
    %6 = arith.addf %3, %5 : vector<2048x32xf32>
    %cst_6 = arith.constant 0.000000e+00 : f32
    %7 = vector.broadcast %cst_6 : f32 to vector<2048x32xf32>
    %8 = arith.maximumf %6, %7 : vector<2048x32xf32>
    %c0_7 = arith.constant 0 : index
    %c0_8 = arith.constant 0 : index
    %9 = vector.load %arg2[%c0_7, %c0_8] : memref<8x2048xbf16, #tpu.memory_space<vmem>>, vector<8x2048xbf16>
    %10 = arith.truncf %8 : vector<2048x32xf32> to vector<2048x32xbf16>
    %cst_9 = arith.constant dense<0.000000e+00> : vector<8x32xf32>
    %11 = tpu.matmul %9, %10, %cst_9 {dimension_numbers = #tpu.dot_dimension_numbers<[1], [0], [0], [1], [0, 0, 1, 1], [], []>} : vector<8x2048xbf16>, vector<2048x32xbf16>, vector<8x32xf32> -> vector<8x32xf32>
    %12 = arith.truncf %11 : vector<8x32xf32> to vector<8x32xbf16>
    %c0_10 = arith.constant 0 : index
    %c0_11 = arith.constant 0 : index
    %13 = vector.load %arg5[%c0_10, %c0_11] : memref<32x128xbf16, #tpu.memory_space<vmem>>, vector<32x128xbf16>
    %cst_12 = arith.constant dense<0.000000e+00> : vector<8x128xf32>
    %14 = tpu.matmul %12, %13, %cst_12 {dimension_numbers = #tpu.dot_dimension_numbers<[1], [0], [0], [1], [0, 0, 1, 1], [], []>} : vector<8x32xbf16>, vector<32x128xbf16>, vector<8x128xf32> -> vector<8x128xf32>
    %c0_13 = arith.constant 0 : index
    %c0_14 = arith.constant 0 : index
    %15 = vector.load %arg6[%c0_13, %c0_14] : memref<1x128xf32, #tpu.memory_space<vmem>>, vector<1x128xf32>
    %16 = vector.broadcast %15 : vector<1x128xf32> to vector<8x128xf32>
    %17 = arith.addf %14, %16 : vector<8x128xf32>
    %c0_15 = arith.constant 0 : index
    %c0_16 = arith.constant 0 : index
    %18 = vector.load %arg7[%c0_15, %c0_16] : memref<8x128xf32, #tpu.memory_space<vmem>>, vector<8x128xf32>
    tpu.vector_store %arg7[%c0_15, %c0_16], %17 {strides = array<i32>} : memref<8x128xf32, #tpu.memory_space<vmem>>, vector<8x128xf32>,
    return
  }
  func.func @transform_0(%arg0: i32) -> (i32, i32, i32) {
    %c0_i32 = arith.constant 0 : i32
    %c0_i32_0 = arith.constant 0 : i32
    %c0_i32_1 = arith.constant 0 : i32
    return %arg0, %c0_i32, %c0_i32_0 : i32, i32, i32
  }
  func.func @transform_1(%arg0: i32) -> (i32, i32) {
    %c0_i32 = arith.constant 0 : i32
    %c0_i32_0 = arith.constant 0 : i32
    %c0_i32_1 = arith.constant 0 : i32
    return %c0_i32, %c0_i32_0 : i32, i32
  }
  func.func @transform_2(%arg0: i32) -> (i32, i32) {
    %c0_i32 = arith.constant 0 : i32
    %c0_i32_0 = arith.constant 0 : i32
    %c0_i32_1 = arith.constant 0 : i32
    return %c0_i32, %c0_i32_0 : i32, i32
  }
  func.func @transform_3(%arg0: i32) -> (i32, i32) {
    %c0_i32 = arith.constant 0 : i32
    %c0_i32_0 = arith.constant 0 : i32
    %c0_i32_1 = arith.constant 0 : i32
    return %c0_i32, %c0_i32_0 : i32, i32
  }
  func.func @transform_4(%arg0: i32) -> (i32, i32) {
    %c0_i32 = arith.constant 0 : i32
    %c0_i32_0 = arith.constant 0 : i32
    %c0_i32_1 = arith.constant 0 : i32
    return %c0_i32, %c0_i32_0 : i32, i32
  }
  func.func @transform_5(%arg0: i32) -> (i32, i32) {
    %c0_i32 = arith.constant 0 : i32
    %c0_i32_0 = arith.constant 0 : i32
    %c0_i32_1 = arith.constant 0 : i32
    return %c0_i32, %c0_i32_0 : i32, i32
  }
  func.func @transform_6(%arg0: i32) -> (i32, i32) {
    %c0_i32 = arith.constant 0 : i32
    %c0_i32_0 = arith.constant 0 : i32
    return %arg0, %c0_i32 : i32, i32
  }
}

</mosaic_0001>

<bundles_post_ra>
// kernel: tpu_custom_call.1
= control target key start
LH: loop header
LB: loop body
LE: loop exit
PB: predicated region body
PF: predicated region fallthrough
CT: control target
= control target key end

     0   :  { %11 = vsyncpa [#allocation3], 0  ;;  %s4873_s0 = inlined_call_operand.hbm [shape: bf16[8,256,128], index: 0, kind: input, shape index: {}]   ;;  %s4874_s1 = inlined_call_operand.vmem [shape: bf16[8,2048], index: 1, kind: input, shape index: {}]   ;;  %s4875_s2 = inlined_call_operand.vmem [shape: bf16[128,32], index: 2, kind: input, shape index: {}]   ;;  %s4876_s3 = inlined_call_operand.vmem [shape: f32[1,32], index: 3, kind: input, shape index: {}]   ;;  %s4877_s4 = inlined_call_operand.vmem [shape: bf16[32,128], index: 4, kind: input, shape index: {}]   ;;  %s4878_s5 = inlined_call_operand.vmem [shape: f32[1,128], index: 5, kind: input, shape index: {}]   ;;  %s4879_s6 = inlined_call_operand.hbm [shape: f32[8,128], index: 6, kind: output, shape index: {}]  }
   0x1   :  { %12 = vsyncpa [#allocation4], 0  ;;  %s4017_s21 = smov [#allocation2]  }
   0x2   :  { %s18_s22 = sshll.u32 %s4017_s21, 4  ;;  %s19_s22 = int_to_ptr.vmem [resolvable:$true] %s18_s22 }
   0x3   :  { %s3981_s23 = scalar_lea.vmem %s19_s22, 16384  ;;  %p3986_p1 = scmp.lt.s32.totalorder %s19_s22, %s19_s22 }
   0x4   :  { %p3982_p0 = scmp.ne.s32.totalorder %s19_s22, %s3981_s23  ;;  %p3987_p2 = scmp.lt.s32.totalorder %s3981_s23, %s3981_s23 }
   0x6   :  { %p3988_p3 = por %p3987_p2, %p3986_p1 }
   0x8   :  { %p3989_p4 = pnand %p3988_p3, %p3982_p0 }
   0xa   :  { %3992 = shalt.err (!%p3989_p4)
}
   0xb   :  { %s4018_s24 = smov 64   ;;  %s4019_s25 = smov 4  }
   0xc   :  { %24 = dma.hbm_to_vmem [thread:$0]  %s4873_s0, 16384, %s19_s22, [#allocation3], %s4018_s24, %s4018_s24, %s4019_s25  }
   0xd   :  { %4013 = dma.done.wait [#allocation3], 16384  }
   0xe   :  { %4014 = vsyncadd [#allocation3], 4294950912  ;;  %v3817_v0 = vld [vmem:[%s4875_s2 + $0x38] sm:$0xff]   ;;  %v3818_v1 = vld [vmem:[%s4875_s2 + $0x30] sm:$0xff]   ;;  %vm4021_vm0 = vmmov 0   ;;  %vm2983_vm1 = vcmask 261120  }
   0xf   :  { %3515 = vmatprep.subr.bf16.mxu0 %v3817_v0  ;;  %3795 = vmatprep.subr.bf16.mxu1 %v3817_v0  ;;  %v3819_v2 = vld [vmem:[%s4875_s2 + $0x28] sm:$0xff]   ;;  %v3820_v3 = vld [vmem:[%s4875_s2 + $0x20] sm:$0xff]   ;;  %v3821_v5 = vld [vmem:[%s4875_s2 + $0x18] sm:$0xff]   ;;  %s4022_s18 = smov [#allocation5]  }
  0x10   :  { %3516 = vmatpush3.bf16.msra.mxu0 %v3817_v0  ;;  %3803 = vmatpush3.bf16.msra.mxu1 %v3817_v0  ;;  %v3825_v4 = vld [vmem:[#allocation2] sm:$0xff]   ;;  %v3822_v6 = vld [vmem:[%s4875_s2 + $0x10] sm:$0xff]   ;;  %v3823_v7 = vld [vmem:[%s4875_s2 + $0x8] sm:$0xff]  }
  0x11   :  { %3517 = vmatprep.subr.bf16.mxu0 %v3818_v1  ;;  %3796 = vmatprep.subr.bf16.mxu1 %v3818_v1  ;;  %v3824_v8 = vld [vmem:[%s4875_s2] sm:$0xff]   ;;  %v3826_v9 = vld [vmem:[#allocation2 + $0x8] sm:$0xff]   ;;  %v3827_v10 = vld [vmem:[#allocation2 + $0x10] sm:$0xff]   ;;  %s3034_s2 = sshll.u32 %s4022_s18, 4  ;;  %s3035_s2 = int_to_ptr.vmem [resolvable:$true] %s3034_s2 }
  0x12   :  { %3531 = vmatprep.mubr.bf16.mxu0 %v3825_v4  ;;  %v3828_v11 = vld [vmem:[#allocation2 + $0x18] sm:$0xff]   ;;  %v3829_v12 = vld [vmem:[#allocation2 + $0x20] sm:$0xff]   ;;  %v3830_v13 = vld [vmem:[#allocation2 + $0x28] sm:$0xff]   ;;  %s3993_s19 = scalar_lea.vmem %s3035_s2, 128  ;;  %p3998_p6 = scmp.lt.s32.totalorder %s3035_s2, %s3035_s2 }
  0x13   :  { %v3831_v14 = vld [vmem:[#allocation2 + $0x30] sm:$0xff]   ;;  %v3832_v15 = vld [vmem:[#allocation2 + $0x38] sm:$0xff]   ;;  %v3833_v16 = vld [vmem:[#allocation2 + $0x40] sm:$0xff]   ;;  %p3994_p5 = scmp.ne.s32.totalorder %s3035_s2, %s3993_s19  ;;  %p3999_p7 = scmp.lt.s32.totalorder %s3993_s19, %s3993_s19 }
  0x14   :  { %3518 = vmatpush3.bf16.msra.mxu0 %v3818_v1  ;;  %3804 = vmatpush3.bf16.msra.mxu1 %v3818_v1  ;;  %v3834_v17 = vld [vmem:[#allocation2 + $0x48] sm:$0xff]   ;;  %v3835_v18 = vld [vmem:[#allocation2 + $0x50] sm:$0xff]   ;;  %v3836_v19 = vld [vmem:[#allocation2 + $0x58] sm:$0xff]  }
  0x15   :  { %3519 = vmatprep.subr.bf16.mxu0 %v3819_v2  ;;  %3797 = vmatprep.subr.bf16.mxu1 %v3819_v2  ;;  %v3837_v20 = vld [vmem:[#allocation2 + $0x60] sm:$0xff]   ;;  %v3838_v21 = vld [vmem:[#allocation2 + $0x68] sm:$0xff]   ;;  %v3839_v22 = vld [vmem:[#allocation2 + $0x70] sm:$0xff]   ;;  %p4000_p8 = por %p3999_p7, %p3998_p6 }
  0x16   :  { %v3840_v23 = vld [vmem:[#allocation2 + $0x78] sm:$0xff]   ;;  %v3841_v24 = vld [vmem:[#allocation2 + $0x80] sm:$0xff]   ;;  %v3873_v25 = vld [vmem:[#allocation2 + $0x2f0] sm:$0xff]  }
  0x17   :  { %v3874_v26 = vld [vmem:[#allocation2 + $0x2f8] sm:$0xff]   ;;  %v3842_v27 = vld [vmem:[#allocation2 + $0x88] sm:$0xff]   ;;  %3719 = vmatprep.mubr.bf16.mxu1 %v3873_v25  ;;  %v3843_v28 = vld [vmem:[#allocation2 + $0x90] sm:$0xff]   ;;  %p4001_p9 = pnand %p4000_p8, %p3994_p5 }
  0x18   :  { %3520 = vmatpush3.bf16.msra.mxu0 %v3819_v2  ;;  %3805 = vmatpush3.bf16.msra.mxu1 %v3819_v2  ;;  %v3877_v29 = vld [vmem:[#allocation2 + $0x300] sm:$0xff]   ;;  %v3844_v30 = vld [vmem:[#allocation2 + $0x98] sm:$0xff]   ;;  %v3878_v31 = vld [vmem:[#allocation2 + $0x308] sm:$0xff]  }
  0x19   :  { %3521 = vmatprep.subr.bf16.mxu0 %v3820_v3  ;;  %3798 = vmatprep.subr.bf16.mxu1 %v3820_v3  ;;  %v3845_v32 = vld [vmem:[#allocation2 + $0xa0] sm:$0xff]   ;;  %v3881_v33 = vld [vmem:[#allocation2 + $0x310] sm:$0xff]   ;;  %v3846_v34 = vld [vmem:[#allocation2 + $0xa8] sm:$0xff]  }
  0x1a   :  { %v3882_v35 = vld [vmem:[#allocation2 + $0x318] sm:$0xff]   ;;  %v3847_v36 = vld [vmem:[#allocation2 + $0xb0] sm:$0xff]   ;;  %v3885_v37 = vld [vmem:[#allocation2 + $0x320] sm:$0xff]  }
  0x1b   :  { %v3886_v38 = vld [vmem:[#allocation2 + $0x328] sm:$0xff]   ;;  %v3848_v39 = vld [vmem:[#allocation2 + $0xb8] sm:$0xff]   ;;  %v3849_v40 = vld [vmem:[#allocation2 + $0xc0] sm:$0xff]  }
  0x1c   :  { %3522 = vmatpush3.bf16.msra.mxu0 %v3820_v3  ;;  %3806 = vmatpush3.bf16.msra.mxu1 %v3820_v3  ;;  %v3889_v41 = vld [vmem:[#allocation2 + $0x330] sm:$0xff]   ;;  %v3890_v42 = vld [vmem:[#allocation2 + $0x338] sm:$0xff]   ;;  %v3850_v43 = vld [vmem:[#allocation2 + $0xc8] sm:$0xff]  }
  0x1d   :  { %3523 = vmatprep.subr.bf16.mxu0 %v3821_v5  ;;  %3799 = vmatprep.subr.bf16.mxu1 %v3821_v5  ;;  %v3851_v44 = vld [vmem:[#allocation2 + $0xd0] sm:$0xff]   ;;  %v3893_v45 = vld [vmem:[#allocation2 + $0x340] sm:$0xff]   ;;  %v3894_v46 = vld [vmem:[#allocation2 + $0x348] sm:$0xff]  }
  0x1e   :  { %v3852_v47 = vld [vmem:[#allocation2 + $0xd8] sm:$0xff]   ;;  %v3853_v48 = vld [vmem:[#allocation2 + $0xe0] sm:$0xff]   ;;  %v3897_v49 = vld [vmem:[#allocation2 + $0x350] sm:$0xff]  }
  0x1f   :  { %v3898_v50 = vld [vmem:[#allocation2 + $0x358] sm:$0xff]   ;;  %v3854_v51 = vld [vmem:[#allocation2 + $0xe8] sm:$0xff]   ;;  %v3855_v52 = vld [vmem:[#allocation2 + $0xf0] sm:$0xff]  }
  0x20   :  { %3524 = vmatpush3.bf16.msra.mxu0 %v3821_v5  ;;  %3807 = vmatpush3.bf16.msra.mxu1 %v3821_v5  ;;  %v3901_v53 = vld [vmem:[#allocation2 + $0x360] sm:$0xff]   ;;  %v3902_v54 = vld [vmem:[#allocation2 + $0x368] sm:$0xff]   ;;  %v3856_v55 = vld [vmem:[#allocation2 + $0xf8] sm:$0xff]  }
  0x21   :  { %3525 = vmatprep.subr.bf16.mxu0 %v3822_v6  ;;  %3800 = vmatprep.subr.bf16.mxu1 %v3822_v6  ;;  %v3857_v56 = vld [vmem:[#allocation2 + $0x100] sm:$0xff]   ;;  %v3905_v57 = vld [vmem:[#allocation2 + $0x370] sm:$0xff]   ;;  %v3906_v58 = vld [vmem:[#allocation2 + $0x378] sm:$0xff]  }
  0x22   :  { %v3858_v59 = vld [vmem:[#allocation2 + $0x108] sm:$0xff]   ;;  %v3859_v60 = vld [vmem:[#allocation2 + $0x110] sm:$0xff]   ;;  %v3909_v61 = vld [vmem:[#allocation2 + $0x380] sm:$0xff]  }
  0x23   :  { %v3910_v62 = vld [vmem:[#allocation2 + $0x388] sm:$0xff]   ;;  %v3860_v63 = vld [vmem:[#allocation2 + $0x118] sm:$0xff]   ;;  %v3861_v0 = vld [vmem:[#allocation2 + $0x120] sm:$0xff]  }
  0x24   :  { %3526 = vmatpush3.bf16.msra.mxu0 %v3822_v6  ;;  %3808 = vmatpush3.bf16.msra.mxu1 %v3822_v6  ;;  %v3913_v1 = vld [vmem:[#allocation2 + $0x390] sm:$0xff]   ;;  %v3914_v2 = vld [vmem:[#allocation2 + $0x398] sm:$0xff]   ;;  %v3862_v3 = vld [vmem:[#allocation2 + $0x128] sm:$0xff]  }
  0x25   :  { %3527 = vmatprep.subr.bf16.mxu0 %v3823_v7  ;;  %3801 = vmatprep.subr.bf16.mxu1 %v3823_v7  ;;  %v3863_v4 = vld [vmem:[#allocation2 + $0x130] sm:$0xff]   ;;  %v3917_v5 = vld [vmem:[#allocation2 + $0x3a0] sm:$0xff]   ;;  %v3918_v6 = vld [vmem:[#allocation2 + $0x3a8] sm:$0xff]  }
  0x26   :  { %v3937_v25 = vld [vmem:[#allocation2 + $0x3f0] sm:$0xff]  }
  0x28   :  { %3528 = vmatpush3.bf16.msra.mxu0 %v3823_v7  ;;  %3809 = vmatpush3.bf16.msra.mxu1 %v3823_v7  ;;  %v3864_v7 = vld [vmem:[#allocation2 + $0x138] sm:$0xff]  }
  0x29   :  { %3529 = vmatprep.subr.bf16.mxu0 %v3824_v8  ;;  %3802 = vmatprep.subr.bf16.mxu1 %v3824_v8 }
  0x2c   :  { %3530 = vmatpush3.bf16.msra.mxu0 %v3824_v8  ;;  %3810 = vmatpush3.bf16.msra.mxu1 %v3824_v8  ;;  %v3865_v8 = vld [vmem:[#allocation2 + $0x140] sm:$0xff]  }
  0x2f   :  { %3532 = vmatmul.mubr.bf16.vlgmr.msra.gmra.mxu0 %v3826_v9  ;;  %3720 = vmatmul.mubr.bf16.vlgmr.msra.gmra.mxu1 %v3874_v26  ;;  %v3921_v9 = vld [vmem:[#allocation2 + $0x3b0] sm:$0xff]   ;;  %v3938_v26 = vld [vmem:[#allocation2 + $0x3f8] sm:$0xff]  }
  0x30   :  { %3535 = vmatprep.mubr.bf16.mxu0 %v3827_v10  ;;  %3723 = vmatprep.mubr.bf16.mxu1 %v3877_v29  ;;  %v3922_v10 = vld [vmem:[#allocation2 + $0x3b8] sm:$0xff]  }
  0x37   :  { %3536 = vmatmul.mubr.bf16.gmra.mxu0 %v3828_v11  ;;  %3724 = vmatmul.mubr.bf16.gmra.mxu1 %v3878_v31  ;;  %v3866_v11 = vld [vmem:[#allocation2 + $0x148] sm:$0xff]   ;;  %v4093_v31 = vld [vmem:[%s4874_s1] sm:$0xff] }
  0x38   :  { %3539 = vmatprep.mubr.bf16.mxu0 %v3829_v12  ;;  %3727 = vmatprep.mubr.bf16.mxu1 %v3881_v33  ;;  %v3867_v12 = vld [vmem:[#allocation2 + $0x150] sm:$0xff]  }
  0x3f   :  { %3540 = vmatmul.mubr.bf16.gmra.mxu0 %v3830_v13  ;;  %3728 = vmatmul.mubr.bf16.gmra.mxu1 %v3882_v35  ;;  %v3925_v13 = vld [vmem:[#allocation2 + $0x3c0] sm:$0xff]  }
  0x40   :  { %3543 = vmatprep.mubr.bf16.mxu0 %v3831_v14  ;;  %3731 = vmatprep.mubr.bf16.mxu1 %v3885_v37  ;;  %v3926_v14 = vld [vmem:[#allocation2 + $0x3c8] sm:$0xff]  }
  0x47   :  { %3544 = vmatmul.mubr.bf16.gmra.mxu0 %v3832_v15  ;;  %3732 = vmatmul.mubr.bf16.gmra.mxu1 %v3886_v38  ;;  %v3868_v15 = vld [vmem:[#allocation2 + $0x158] sm:$0xff]  }
  0x48   :  { %3547 = vmatprep.mubr.bf16.mxu0 %v3833_v16  ;;  %3735 = vmatprep.mubr.bf16.mxu1 %v3889_v41  ;;  %v3869_v16 = vld [vmem:[#allocation2 + $0x160] sm:$0xff]  }
  0x4f   :  { %3548 = vmatmul.mubr.bf16.gmra.mxu0 %v3834_v17  ;;  %3736 = vmatmul.mubr.bf16.gmra.mxu1 %v3890_v42  ;;  %v3929_v17 = vld [vmem:[#allocation2 + $0x3d0] sm:$0xff]  }
  0x50   :  { %3551 = vmatprep.mubr.bf16.mxu0 %v3835_v18  ;;  %3739 = vmatprep.mubr.bf16.mxu1 %v3893_v45  ;;  %v3930_v18 = vld [vmem:[#allocation2 + $0x3d8] sm:$0xff]  }
  0x57   :  { %3552 = vmatmul.mubr.bf16.gmra.mxu0 %v3836_v19  ;;  %3740 = vmatmul.mubr.bf16.gmra.mxu1 %v3894_v46  ;;  %v3870_v19 = vld [vmem:[#allocation2 + $0x168] sm:$0xff]  }
  0x58   :  { %3555 = vmatprep.mubr.bf16.mxu0 %v3837_v20  ;;  %3743 = vmatprep.mubr.bf16.mxu1 %v3897_v49  ;;  %v3871_v20 = vld [vmem:[#allocation2 + $0x170] sm:$0xff]  }
  0x5f   :  { %3556 = vmatmul.mubr.bf16.gmra.mxu0 %v3838_v21  ;;  %3744 = vmatmul.mubr.bf16.gmra.mxu1 %v3898_v50  ;;  %v3933_v21 = vld [vmem:[#allocation2 + $0x3e0] sm:$0xff]  }
  0x60   :  { %3559 = vmatprep.mubr.bf16.mxu0 %v3839_v22  ;;  %3747 = vmatprep.mubr.bf16.mxu1 %v3901_v53  ;;  %v3934_v22 = vld [vmem:[#allocation2 + $0x3e8] sm:$0xff]  }
  0x67   :  { %3560 = vmatmul.mubr.bf16.gmra.mxu0 %v3840_v23  ;;  %3748 = vmatmul.mubr.bf16.gmra.mxu1 %v3902_v54  ;;  %v3872_v23 = vld [vmem:[#allocation2 + $0x178] sm:$0xff]  }
  0x68   :  { %3563 = vmatprep.mubr.bf16.mxu0 %v3841_v24  ;;  %3751 = vmatprep.mubr.bf16.mxu1 %v3905_v57  ;;  %v3875_v24 = vld [vmem:[#allocation2 + $0x180] sm:$0xff]  }
  0x6f   :  { %3564 = vmatmul.mubr.bf16.gmra.mxu0 %v3842_v27  ;;  %3752 = vmatmul.mubr.bf16.gmra.mxu1 %v3906_v58  ;;  %v3876_v27 = vld [vmem:[#allocation2 + $0x188] sm:$0xff]  }
  0x70   :  { %3567 = vmatprep.mubr.bf16.mxu0 %v3843_v28  ;;  %3755 = vmatprep.mubr.bf16.mxu1 %v3909_v61  ;;  %v3879_v28 = vld [vmem:[#allocation2 + $0x190] sm:$0xff]  }
  0x77   :  { %3568 = vmatmul.mubr.bf16.gmra.mxu0 %v3844_v30  ;;  %3756 = vmatmul.mubr.bf16.gmra.mxu1 %v3910_v62  ;;  %v4088_v30 = vld [vmem:[%s4876_s3] ss:$0 sm:$0xff] }
  0x78   :  { %3571 = vmatprep.mubr.bf16.mxu0 %v3845_v32  ;;  %3759 = vmatprep.mubr.bf16.mxu1 %v3913_v1  ;;  %v3181_v32 = vcombine.high %v4093_v31, %v4093_v31 }
  0x7f   :  { %3572 = vmatmul.mubr.bf16.gmra.mxu0 %v3846_v34  ;;  %3760 = vmatmul.mubr.bf16.gmra.mxu1 %v3914_v2 }
  0x80   :  { %3575 = vmatprep.mubr.bf16.mxu0 %v3847_v36  ;;  %3763 = vmatprep.mubr.bf16.mxu1 %v3917_v5  ;;  %v3880_v36 = vld [vmem:[#allocation2 + $0x198] sm:$0xff]  }
  0x87   :  { %3576 = vmatmul.mubr.bf16.gmra.mxu0 %v3848_v39  ;;  %3764 = vmatmul.mubr.bf16.gmra.mxu1 %v3918_v6  ;;  %v3883_v39 = vld [vmem:[#allocation2 + $0x1a0] sm:$0xff]  }
  0x88   :  { %3579 = vmatprep.mubr.bf16.mxu0 %v3849_v40  ;;  %3767 = vmatprep.mubr.bf16.mxu1 %v3921_v9  ;;  %v3892_v9 = vld [vmem:[#allocation2 + $0x1c8] sm:$0xff]  }
  0x8f   :  { %3580 = vmatmul.mubr.bf16.gmra.mxu0 %v3850_v43  ;;  %3768 = vmatmul.mubr.bf16.gmra.mxu1 %v3922_v10  ;;  %v3895_v10 = vld [vmem:[#allocation2 + $0x1d0] sm:$0xff]  }
  0x90   :  { %3583 = vmatprep.mubr.bf16.mxu0 %v3851_v44  ;;  %3771 = vmatprep.mubr.bf16.mxu1 %v3925_v13 }
  0x97   :  { %3584 = vmatmul.mubr.bf16.gmra.mxu0 %v3852_v47  ;;  %3772 = vmatmul.mubr.bf16.gmra.mxu1 %v3926_v14 }
  0x98   :  { %3587 = vmatprep.mubr.bf16.mxu0 %v3853_v48  ;;  %3775 = vmatprep.mubr.bf16.mxu1 %v3929_v17 }
  0x9f   :  { %3588 = vmatmul.mubr.bf16.gmra.mxu0 %v3854_v51  ;;  %3776 = vmatmul.mubr.bf16.gmra.mxu1 %v3930_v18 }
  0xa0   :  { %3591 = vmatprep.mubr.bf16.mxu0 %v3855_v52  ;;  %3779 = vmatprep.mubr.bf16.mxu1 %v3933_v21  ;;  %v3884_v52 = vld [vmem:[#allocation2 + $0x1a8] sm:$0xff]  }
  0xa1   :  { %v3900_v21 = vld [vmem:[#allocation2 + $0x1e8] sm:$0xff]  }
  0xa7   :  { %3592 = vmatmul.mubr.bf16.gmra.mxu0 %v3856_v55  ;;  %3780 = vmatmul.mubr.bf16.gmra.mxu1 %v3934_v22  ;;  %v3887_v55 = vld [vmem:[#allocation2 + $0x1b0] sm:$0xff]  }
  0xa8   :  { %3595 = vmatprep.mubr.bf16.mxu0 %v3857_v56  ;;  %3783 = vmatprep.mubr.bf16.mxu1 %v3937_v25  ;;  %v3903_v22 = vld [vmem:[#allocation2 + $0x1f0] sm:$0xff]  }
  0xaf   :  { %3596 = vmatmul.mubr.bf16.gmra.mxu0 %v3858_v59  ;;  %3784 = vmatmul.mubr.bf16.gmra.mxu1 %v3938_v26 }
  0xb0   :  { %3599 = vmatprep.mubr.bf16.mxu0 %v3859_v60  ;;  %2671 = vmatprep.mubr.bf16.mxu1 %v3181_v32 }
  0xb7   :  { %3600 = vmatmul.mubr.bf16.gmra.mxu0 %v3860_v63 }
  0xb8   :  { %3603 = vmatprep.mubr.bf16.mxu0 %v3861_v0 }
  0xbf   :  { %3604 = vmatmul.mubr.bf16.gmra.mxu0 %v3862_v3  ;;  %v3888_v3 = vld [vmem:[#allocation2 + $0x1b8] sm:$0xff]  }
  0xc0   :  { %3607 = vmatprep.mubr.bf16.mxu0 %v3863_v4  ;;  %v3891_v4 = vld [vmem:[#allocation2 + $0x1c0] sm:$0xff]  }
  0xc7   :  { %3608 = vmatmul.mubr.bf16.gmra.mxu0 %v3864_v7 }
  0xc8   :  { %3611 = vmatprep.mubr.bf16.mxu0 %v3865_v8 }
  0xcf   :  { %3612 = vmatmul.mubr.bf16.gmra.mxu0 %v3866_v11 }
  0xd0   :  { %3615 = vmatprep.mubr.bf16.mxu0 %v3867_v12 }
  0xd7   :  { %3616 = vmatmul.mubr.bf16.gmra.mxu0 %v3868_v15  ;;  %v3896_v15 = vld [vmem:[#allocation2 + $0x1d8] sm:$0xff]  }
  0xd8   :  { %3619 = vmatprep.mubr.bf16.mxu0 %v3869_v16  ;;  %v3899_v16 = vld [vmem:[#allocation2 + $0x1e0] sm:$0xff]  }
  0xdf   :  { %3620 = vmatmul.mubr.bf16.gmra.mxu0 %v3870_v19 }
  0xe0   :  { %3623 = vmatprep.mubr.bf16.mxu0 %v3871_v20 }
  0xe7   :  { %3624 = vmatmul.mubr.bf16.gmra.mxu0 %v3872_v23 }
  0xe8   :  { %3627 = vmatprep.mubr.bf16.mxu0 %v3875_v24 }
  0xef   :  { %v3533_v29 = vpop.f32.mrf.mxu0  ;;  %3628 = vmatmul.mubr.bf16.gmra.mxu0 %v3876_v27  ;;  %v3904_v27 = vld [vmem:[#allocation2 + $0x1f8] sm:$0xff]  }
  0xf0   :  { %3631 = vmatprep.mubr.bf16.mxu0 %v3879_v28  ;;  %v1177_v34 = vadd.f32 %v3533_v29, %v4088_v30  ;;  %v3907_v28 = vld [vmem:[#allocation2 + $0x200] sm:$0xff]  }
  0xf1   :  { %v1168_v33 = vpop.f32.mrf.mxu0 }
  0xf2   :  { %v1169_v37 = vadd.f32 %v4088_v30, %v1168_v33  ;;  %v2193_v41 = vmax.f32 %v1177_v34, 0.0 }
  0xf3   :  { %v3534_v35 = vpop.f32.mrf.mxu0 }
  0xf4   :  { %v1180_v38 = vadd.f32 %v3534_v35, %v4088_v30  ;;  %v2191_v45 = vmax.f32 %v1169_v37, 0.0 }
  0xf5   :  { %v1171_v40 = vpop.f32.mrf.mxu0 }
  0xf6   :  { %v2194_v42 = vmax.f32 %v1180_v38, 0.0  ;;  %v1172_v43 = vadd.f32 %v4088_v30, %v1171_v40  ;;  %v3908_v38 = vld [vmem:[#allocation2 + $0x208] sm:$0xff]  }
  0xf7   :  { %v3537_v44 = vpop.f32.mrf.mxu0  ;;  %3632 = vmatmul.mubr.bf16.gmra.mxu0 %v3880_v36 }
  0xf8   :  { %v4101_v46 = vpack.c.bf16 %v2194_v42, %v2193_v41  ;;  %v2192_v47 = vmax.f32 %v1172_v43, 0.0  ;;  %3635 = vmatprep.mubr.bf16.mxu0 %v3883_v39  ;;  %v1193_v50 = vadd.f32 %v3537_v44, %v4088_v30  ;;  %v3911_v41 = vld [vmem:[#allocation2 + $0x210] sm:$0xff]  }
  0xf9   :  { %v1184_v48 = vpop.f32.mrf.mxu0 }
  0xfa   :  { %v4103_v49 = vpack.c.bf16 %v2192_v47, %v2191_v45  ;;  %v1185_v53 = vadd.f32 %v4088_v30, %v1184_v48  ;;  %v2197_v57 = vmax.f32 %v1193_v50, 0.0 }
  0xfb   :  { %v3538_v51 = vpop.f32.mrf.mxu0 }
  0xfc   :  { %v1196_v54 = vadd.f32 %v3538_v51, %v4088_v30  ;;  %v2195_v61 = vmax.f32 %v1185_v53, 0.0 }
  0xfd   :  { %v1187_v56 = vpop.f32.mrf.mxu0 }
  0xfe   :  { %v2198_v58 = vmax.f32 %v1196_v54, 0.0  ;;  %v1188_v59 = vadd.f32 %v4088_v30, %v1187_v56 }
  0xff   :  { %v4109_v60 = vpop.f32.mrf.mxu0  ;;  %3636 = vmatmul.mubr.bf16.gmra.mxu0 %v3884_v52 }
 0x100   :  { %v4111_v62 = vpack.c.bf16 %v2198_v58, %v2197_v57  ;;  %v2196_v63 = vmax.f32 %v1188_v59, 0.0  ;;  %3639 = vmatprep.mubr.bf16.mxu0 %v3887_v55 }
 0x101   :  { %v4113_v0 = vpop.f32.mrf.mxu0 }
 0x102   :  { %v4115_v1 = vpack.c.bf16 %v2196_v63, %v2195_v61 }
 0x103   :  { %v3542_v2 = vpop.f32.mrf.mxu0 }
 0x104   :  { %v1212_v55 = vadd.f32 %v3542_v2, %v4088_v30 }
 0x105   :  { %v4117_v5 = vpop.f32.mrf.mxu0 }
 0x107   :  { %v3545_v6 = vpop.f32.mrf.mxu0  ;;  %3640 = vmatmul.mubr.bf16.gmra.mxu0 %v3888_v3 }
 0x108   :  { %3643 = vmatprep.mubr.bf16.mxu0 %v3891_v4  ;;  %v1225_v36 = vadd.f32 %v3545_v6, %v4088_v30 }
 0x109   :  { %v1216_v7 = vpop.f32.mrf.mxu0 }
 0x10a   :  { %v2205_v51 = vmax.f32 %v1225_v36, 0.0  ;;  %v1217_v52 = vadd.f32 %v4088_v30, %v1216_v7  ;;  %v1201_v36 = vadd.f32 %v4088_v30, %v4113_v0 }
 0x10b   :  { %v3546_v8 = vpop.f32.mrf.mxu0 }
 0x10c   :  { %v1228_v33 = vadd.f32 %v3546_v8, %v4088_v30  ;;  %v1209_v8 = vadd.f32 %v4109_v60, %v4088_v30 }
 0x10d   :  { %v1219_v11 = vpop.f32.mrf.mxu0 }
 0x10e   :  { %v2206_v42 = vmax.f32 %v1228_v33, 0.0  ;;  %v1220_v43 = vadd.f32 %v4088_v30, %v1219_v11  ;;  %v3912_v11 = vld [vmem:[#allocation2 + $0x218] sm:$0xff]  }
 0x10f   :  { %v4119_v12 = vpop.f32.mrf.mxu0  ;;  %3644 = vmatmul.mubr.bf16.gmra.mxu0 %v3892_v9  ;;  %v2203_v9 = vmax.f32 %v1217_v52, 0.0  ;;  %v3916_v52 = vld [vmem:[#allocation2 + $0x228] sm:$0xff]  }
 0x110   :  { %3647 = vmatprep.mubr.bf16.mxu0 %v3895_v10  ;;  %v2462_v59 = vpack.c.bf16 %v2206_v42, %v2205_v51  ;;  %v2204_v61 = vmax.f32 %v1220_v43, 0.0 }
 0x111   :  { %v4121_v13 = vpop.f32.mrf.mxu0 }
 0x113   :  { %v4123_v14 = vpop.f32.mrf.mxu0 }
 0x115   :  { %v4125_v17 = vpop.f32.mrf.mxu0 }
 0x117   :  { %v4127_v18 = vpop.f32.mrf.mxu0  ;;  %3648 = vmatmul.mubr.bf16.gmra.mxu0 %v3896_v15  ;;  %v2202_v15 = vmax.f32 %v1212_v55, 0.0 }
 0x118   :  { %3651 = vmatprep.mubr.bf16.mxu0 %v3899_v16 }
 0x119   :  { %v4129_v19 = vpop.f32.mrf.mxu0 }
 0x11b   :  { %v4131_v20 = vpop.f32.mrf.mxu0 }
 0x11c   :  { %v1260_v60 = vadd.f32 %v4131_v20, %v4088_v30 }
 0x11d   :  { %v4133_v23 = vpop.f32.mrf.mxu0 }
 0x11e   :  { %v2214_v43 = vmax.f32 %v1260_v60, 0.0  ;;  %v1252_v0 = vadd.f32 %v4088_v30, %v4133_v23 }
 0x11f   :  { %v3557_v24 = vpop.f32.mrf.mxu0  ;;  %3652 = vmatmul.mubr.bf16.gmra.mxu0 %v3900_v21 }
 0x120   :  { %3655 = vmatprep.mubr.bf16.mxu0 %v3903_v22  ;;  %v1273_v53 = vadd.f32 %v3557_v24, %v4088_v30  ;;  %v3915_v24 = vld [vmem:[#allocation2 + $0x220] sm:$0xff]  }
 0x121   :  { %v1264_v25 = vpop.f32.mrf.mxu0 }
 0x122   :  { %v2217_v10 = vmax.f32 %v1273_v53, 0.0  ;;  %v1265_v16 = vadd.f32 %v4088_v30, %v1264_v25  ;;  %v1249_v53 = vadd.f32 %v4088_v30, %v4129_v19  ;;  %v1241_v19 = vadd.f32 %v4119_v12, %v4088_v30 }
 0x123   :  { %v3558_v26 = vpop.f32.mrf.mxu0 }
 0x124   :  { %v1276_v44 = vadd.f32 %v3558_v26, %v4088_v30  ;;  %v1204_v26 = vadd.f32 %v4088_v30, %v4117_v5  ;;  %v2215_v5 = vmax.f32 %v1265_v16, 0.0 }
 0x125   :  { %v1267_v29 = vpop.f32.mrf.mxu0 }
 0x126   :  { %v2218_v63 = vmax.f32 %v1276_v44, 0.0  ;;  %v1268_v4 = vadd.f32 %v4088_v30, %v1267_v29  ;;  %v2200_v42 = vmax.f32 %v1204_v26, 0.0  ;;  %v3923_v26 = vld [vmem:[#allocation2 + $0x240] sm:$0xff]  }
 0x127   :  { %v3561_v32 = vpop.f32.mrf.mxu0  ;;  %3656 = vmatmul.mubr.bf16.gmra.mxu0 %v3904_v27  ;;  %v2461_v27 = vpack.c.bf16 %v2204_v61, %v2203_v9  ;;  %v2212_v61 = vmax.f32 %v1252_v0, 0.0 }
 0x128   :  { %3659 = vmatprep.mubr.bf16.mxu0 %v3907_v28  ;;  %v1289_v35 = vadd.f32 %v3561_v32, %v4088_v30  ;;  %v2468_v28 = vpack.c.bf16 %v2218_v63, %v2217_v10  ;;  %v2216_v32 = vmax.f32 %v1268_v4, 0.0 }
 0x129   :  { %v1280_v34 = vpop.f32.mrf.mxu0 }
 0x12a   :  { %v1281_v39 = vadd.f32 %v4088_v30, %v1280_v34  ;;  %v2221_v47 = vmax.f32 %v1289_v35, 0.0  ;;  %v2201_v35 = vmax.f32 %v1209_v8, 0.0 }
 0x12b   :  { %v3562_v37 = vpop.f32.mrf.mxu0 }
 0x12c   :  { %v1292_v40 = vadd.f32 %v3562_v37, %v4088_v30  ;;  %v2219_v56 = vmax.f32 %v1281_v39, 0.0  ;;  %v1257_v37 = vadd.f32 %v4127_v18, %v4088_v30 }
 0x12d   :  { %v1283_v45 = vpop.f32.mrf.mxu0 }
 0x12e   :  { %v2222_v48 = vmax.f32 %v1292_v40, 0.0  ;;  %v1284_v50 = vadd.f32 %v4088_v30, %v1283_v45 }
 0x12f   :  { %v3565_v54 = vpop.f32.mrf.mxu0  ;;  %3660 = vmatmul.mubr.bf16.gmra.mxu0 %v3908_v38 }
 0x130   :  { %v2470_v57 = vpack.c.bf16 %v2222_v48, %v2221_v47  ;;  %v2220_v58 = vmax.f32 %v1284_v50, 0.0  ;;  %3663 = vmatprep.mubr.bf16.mxu0 %v3911_v41  ;;  %v1305_v6 = vadd.f32 %v3565_v54, %v4088_v30  ;;  %v2460_v41 = vpack.c.bf16 %v2202_v15, %v2201_v35 }
 0x131   :  { %v1296_v3 = vpop.f32.mrf.mxu0  ;;  %v2467_v47 = vpack.c.bf16 %v2216_v32, %v2215_v5  ;;  %v2199_v48 = vmax.f32 %v1201_v36, 0.0  ;;  %v2213_v50 = vmax.f32 %v1257_v37, 0.0  ;;  %v3928_v5 = vld [vmem:[#allocation2 + $0x258] sm:$0xff]  }
 0x132   :  { %3336 = vmatprep.subr.bf16.mxu1 %v2470_v57  ;;  %v2469_v7 = vpack.c.bf16 %v2220_v58, %v2219_v56  ;;  %v1297_v21 = vadd.f32 %v4088_v30, %v1296_v3  ;;  %v2225_v33 = vmax.f32 %v1305_v6, 0.0  ;;  %v3919_v56 = vld [vmem:[#allocation2 + $0x230] sm:$0xff]   ;;  %v1244_v57 = vadd.f32 %v4123_v14, %v4088_v30 }
 0x133   :  { %v3566_v2 = vpop.f32.mrf.mxu0  ;;  %3337 = vmatpush3.bf16.msra.mxu1 %v2462_v59  ;;  %v2459_v23 = vpack.c.bf16 %v2200_v42, %v2199_v48  ;;  %v2466_v58 = vpack.c.bf16 %v2214_v43, %v2213_v50  ;;  %v3932_v42 = vld [vmem:[#allocation2 + $0x268] sm:$0xff]   ;;  %v3935_v43 = vld [vmem:[#allocation2 + $0x270] sm:$0xff]   ;;  %v3936_v48 = vld [vmem:[#allocation2 + $0x278] sm:$0xff]  }
 0x134   :  { %v1308_v22 = vadd.f32 %v3566_v2, %v4088_v30  ;;  %3338 = vmatprep.subr.bf16.mxu1 %v2469_v7  ;;  %v2223_v39 = vmax.f32 %v1297_v21, 0.0  ;;  %v2211_v7 = vmax.f32 %v1249_v53, 0.0  ;;  %v2210_v2 = vmax.f32 %v1244_v57, 0.0  ;;  %v3920_v21 = vld [vmem:[#allocation2 + $0x238] sm:$0xff]   ;;  %v3939_v50 = vld [vmem:[#allocation2 + $0x280] sm:$0xff]   ;;  %v3940_v57 = vld [vmem:[#allocation2 + $0x288] sm:$0xff]  }
 0x135   :  { %v1299_v29 = vpop.f32.mrf.mxu0 }
 0x136   :  { %v2226_v34 = vmax.f32 %v1308_v22, 0.0  ;;  %v1300_v25 = vadd.f32 %v4088_v30, %v1299_v29  ;;  %v2465_v12 = vpack.c.bf16 %v2212_v61, %v2211_v7  ;;  %v2209_v22 = vmax.f32 %v1241_v19, 0.0  ;;  %v3943_v61 = vld [vmem:[#allocation2 + $0x290] sm:$0xff]  }
 0x137   :  { %v3569_v38 = vpop.f32.mrf.mxu0  ;;  %3664 = vmatmul.mubr.bf16.gmra.mxu0 %v3912_v11  ;;  %3339 = vmatpush3.bf16.msra.mxu1 %v2461_v27  ;;  %v1236_v11 = vadd.f32 %v4088_v30, %v4125_v17 }
 0x138   :  { %v4162_v20 = vpack.c.bf16 %v2226_v34, %v2225_v33  ;;  %v2224_v40 = vmax.f32 %v1300_v25, 0.0  ;;  %3340 = vmatprep.subr.bf16.mxu1 %v2468_v28  ;;  %3667 = vmatprep.mubr.bf16.mxu0 %v3915_v24  ;;  %v1321_v18 = vadd.f32 %v3569_v38, %v4088_v30  ;;  %v1233_v24 = vadd.f32 %v4088_v30, %v4121_v13  ;;  %v3924_v34 = vld [vmem:[#allocation2 + $0x248] sm:$0xff]   ;;  %v3927_v13 = vld [vmem:[#allocation2 + $0x250] sm:$0xff]  }
 0x139   :  { %v1312_v44 = vpop.f32.mrf.mxu0  ;;  %v2464_v60 = vpack.c.bf16 %v2210_v2, %v2209_v22  ;;  %v2208_v28 = vmax.f32 %v1236_v11, 0.0  ;;  %v4200_v25 = vld [vmem:[%s4874_s1 + $0x8] sm:$0xff] }
 0x13a   :  { %v4166_v45 = vpack.c.bf16 %v2224_v40, %v2223_v39  ;;  %v1313_v54 = vadd.f32 %v4088_v30, %v1312_v44  ;;  %v2229_v63 = vmax.f32 %v1321_v18, 0.0  ;;  %v2207_v17 = vmax.f32 %v1233_v24, 0.0  ;;  %v3931_v39 = vld [vmem:[#allocation2 + $0x260] sm:$0xff]  }
 0x13b   :  { %v3570_v51 = vpop.f32.mrf.mxu0  ;;  %3341 = vmatpush3.bf16.msra.mxu1 %v2460_v41 }
 0x13c   :  { %v1324_v55 = vadd.f32 %v3570_v51, %v4088_v30  ;;  %3342 = vmatprep.subr.bf16.mxu1 %v2467_v47  ;;  %v2227_v8 = vmax.f32 %v1313_v54, 0.0 }
 0x13d   :  { %v1315_v59 = vpop.f32.mrf.mxu0 }
 0x13e   :  { %v2230_v3 = vmax.f32 %v1324_v55, 0.0  ;;  %v1316_v4 = vadd.f32 %v4088_v30, %v1315_v59 }
 0x13f   :  { %v4178_v6 = vpop.f32.mrf.mxu0  ;;  %3668 = vmatmul.mubr.bf16.gmra.mxu0 %v3916_v52  ;;  %3343 = vmatpush3.bf16.msra.mxu1 %v2459_v23 }
 0x140   :  { %v4180_v9 = vpack.c.bf16 %v2230_v3, %v2229_v63  ;;  %v2228_v10 = vmax.f32 %v1316_v4, 0.0  ;;  %3344 = vmatprep.subr.bf16.mxu1 %v2466_v58  ;;  %3671 = vmatprep.mubr.bf16.mxu0 %v3919_v56 }
 0x141   :  { %v4182_v14 = vpop.f32.mrf.mxu0 }
 0x142   :  { %v4186_v15 = vpack.c.bf16 %v2228_v10, %v2227_v8 }
 0x143   :  { %v4188_v16 = vpop.f32.mrf.mxu0  ;;  %3345 = vmatpush3.bf16.msra.mxu1 %v4111_v62  ;;  %v2463_v62 = vpack.c.bf16 %v2208_v28, %v2207_v17 }
 0x144   :  { %3346 = vmatprep.subr.bf16.mxu1 %v2465_v12  ;;  %v1340_v22 = vadd.f32 %v4188_v16, %v4088_v30 }
 0x145   :  { %v4193_v27 = vpop.f32.mrf.mxu0 }
 0x147   :  { %v3577_v29 = vpop.f32.mrf.mxu0  ;;  %3672 = vmatmul.mubr.bf16.gmra.mxu0 %v3920_v21  ;;  %3347 = vmatpush3.bf16.msra.mxu1 %v4115_v1  ;;  %v3180_v1 = vcombine.low %v4093_v31, %v4093_v31 }
 0x148   :  { %3348 = vmatprep.subr.bf16.mxu1 %v2464_v60  ;;  %3675 = vmatprep.mubr.bf16.mxu0 %v3923_v26  ;;  %v1353_v56 = vadd.f32 %v3577_v29, %v4088_v30 }
 0x149   :  { %v1344_v32 = vpop.f32.mrf.mxu0 }
 0x14a   :  { %v2237_v2 = vmax.f32 %v1353_v56, 0.0  ;;  %v1345_v11 = vadd.f32 %v4088_v30, %v1344_v32  ;;  %v1329_v56 = vadd.f32 %v4088_v30, %v4182_v14 }
 0x14b   :  { %v3578_v33 = vpop.f32.mrf.mxu0  ;;  %3349 = vmatpush3.bf16.msra.mxu1 %v4101_v46  ;;  %v3183_v46 = vcombine.high %v4200_v25, %v4200_v25 }
 0x14c   :  { %3350 = vmatprep.subr.bf16.mxu1 %v2463_v62  ;;  %v1356_v53 = vadd.f32 %v3578_v33, %v4088_v30 }
 0x14d   :  { %v1347_v35 = vpop.f32.mrf.mxu0 }
 0x14e   :  { %v2238_v63 = vmax.f32 %v1356_v53, 0.0  ;;  %v1348_v3 = vadd.f32 %v4088_v30, %v1347_v35  ;;  %v2235_v35 = vmax.f32 %v1345_v11, 0.0  ;;  %v3946_v11 = vld [vmem:[#allocation2 + $0x2a8] sm:$0xff]  }
 0x14f   :  { %v4204_v36 = vpop.f32.mrf.mxu0  ;;  %3676 = vmatmul.mubr.bf16.gmra.mxu0 %v3924_v34  ;;  %3351 = vmatpush3.bf16.msra.mxu1 %v4103_v49 }
 0x150   :  { %3679 = vmatprep.mubr.bf16.mxu0 %v3927_v13  ;;  %v2478_v28 = vpack.c.bf16 %v2238_v63, %v2237_v2  ;;  %v2236_v29 = vmax.f32 %v1348_v3, 0.0  ;;  %v1337_v13 = vadd.f32 %v4178_v6, %v4088_v30 }
 0x151   :  { %v4209_v37 = vpop.f32.mrf.mxu0 }
 0x152   :  { %2672 = vmatmul.mubr.bf16.vlgmr.msra.gmra.mxu1 %v3180_v1 }
 0x153   :  { %v4211_v38 = vpop.f32.mrf.mxu0  ;;  %2711 = vmatprep.mubr.bf16.mxu1 %v3183_v46  ;;  %v3944_v46 = vld [vmem:[#allocation2 + $0x298] sm:$0xff]  }
 0x155   :  { %v4213_v40 = vpop.f32.mrf.mxu0 }
 0x157   :  { %v4215_v31 = vpop.f32.mrf.mxu0  ;;  %3680 = vmatmul.mubr.bf16.gmra.mxu0 %v3928_v5  ;;  %v2234_v5 = vmax.f32 %v1340_v22, 0.0 }
 0x158   :  { %3683 = vmatprep.mubr.bf16.mxu0 %v3931_v39 }
 0x159   :  { %v4217_v41 = vpop.f32.mrf.mxu0 }
 0x15b   :  { %v4219_v49 = vpop.f32.mrf.mxu0 }
 0x15c   :  { %v1388_v6 = vadd.f32 %v4219_v49, %v4088_v30 }
 0x15d   :  { %v4221_v44 = vpop.f32.mrf.mxu0 }
 0x15e   :  { %v2246_v3 = vmax.f32 %v1388_v6, 0.0  ;;  %v1380_v14 = vadd.f32 %v4088_v30, %v4221_v44 }
 0x15f   :  { %v3589_v0 = vpop.f32.mrf.mxu0  ;;  %3684 = vmatmul.mubr.bf16.gmra.mxu0 %v3932_v42 }
 0x160   :  { %3687 = vmatprep.mubr.bf16.mxu0 %v3935_v43  ;;  %v1401_v12 = vadd.f32 %v3589_v0, %v4088_v30  ;;  %v3945_v0 = vld [vmem:[#allocation2 + $0x2a0] sm:$0xff]  }
 0x161   :  { %v1392_v18 = vpop.f32.mrf.mxu0 }
 0x162   :  { %v2249_v1 = vmax.f32 %v1401_v12, 0.0  ;;  %v1393_v39 = vadd.f32 %v4088_v30, %v1392_v18  ;;  %v1377_v12 = vadd.f32 %v4088_v30, %v4217_v41  ;;  %v1369_v41 = vadd.f32 %v4204_v36, %v4088_v30 }
 0x163   :  { %v3590_v47 = vpop.f32.mrf.mxu0 }
 0x164   :  { %v1404_v4 = vadd.f32 %v3590_v47, %v4088_v30  ;;  %v1332_v47 = vadd.f32 %v4088_v30, %v4193_v27  ;;  %v2247_v27 = vmax.f32 %v1393_v39, 0.0 }
 0x165   :  { %v1395_v51 = vpop.f32.mrf.mxu0 }
 0x166   :  { %v2250_v17 = vmax.f32 %v1404_v4, 0.0  ;;  %v1396_v33 = vadd.f32 %v4088_v30, %v1395_v51  ;;  %v2232_v63 = vmax.f32 %v1332_v47, 0.0  ;;  %v3949_v47 = vld [vmem:[#allocation2 + $0x2c0] sm:$0xff]  }
 0x167   :  { %v3593_v52 = vpop.f32.mrf.mxu0  ;;  %3688 = vmatmul.mubr.bf16.gmra.mxu0 %v3936_v48  ;;  %v2477_v48 = vpack.c.bf16 %v2236_v29, %v2235_v35  ;;  %v2244_v29 = vmax.f32 %v1380_v14, 0.0 }
 0x168   :  { %3691 = vmatprep.mubr.bf16.mxu0 %v3939_v50  ;;  %v1417_v55 = vadd.f32 %v3593_v52, %v4088_v30  ;;  %v2484_v50 = vpack.c.bf16 %v2250_v17, %v2249_v1  ;;  %v2248_v52 = vmax.f32 %v1396_v33, 0.0 }
 0x169   :  { %v1408_v54 = vpop.f32.mrf.mxu0 }
 0x16a   :  { %v1409_v58 = vadd.f32 %v4088_v30, %v1408_v54  ;;  %v2253_v7 = vmax.f32 %v1417_v55, 0.0  ;;  %v2233_v55 = vmax.f32 %v1337_v13, 0.0 }
 0x16b   :  { %v3594_v23 = vpop.f32.mrf.mxu0 }
 0x16c   :  { %v1420_v59 = vadd.f32 %v3594_v23, %v4088_v30  ;;  %v2251_v24 = vmax.f32 %v1409_v58, 0.0  ;;  %v1385_v23 = vadd.f32 %v4215_v31, %v4088_v30 }
 0x16d   :  { %v1411_v19 = vpop.f32.mrf.mxu0 }
 0x16e   :  { %v2254_v8 = vmax.f32 %v1420_v59, 0.0  ;;  %v1412_v10 = vadd.f32 %v4088_v30, %v1411_v19 }
 0x16f   :  { %v3597_v21 = vpop.f32.mrf.mxu0  ;;  %3692 = vmatmul.mubr.bf16.gmra.mxu0 %v3940_v57 }
 0x170   :  { %v2486_v26 = vpack.c.bf16 %v2254_v8, %v2253_v7  ;;  %v2252_v60 = vmax.f32 %v1412_v10, 0.0  ;;  %3695 = vmatprep.mubr.bf16.mxu0 %v3943_v61  ;;  %v1433_v34 = vadd.f32 %v3597_v21, %v4088_v30  ;;  %v2476_v61 = vpack.c.bf16 %v2234_v5, %v2233_v55  ;;  %v4295_v55 = vld [vmem:[%s4874_s1 + $0x10] sm:$0xff] }
 0x171   :  { %v1424_v62 = vpop.f32.mrf.mxu0  ;;  %v2483_v7 = vpack.c.bf16 %v2248_v52, %v2247_v27  ;;  %v2231_v8 = vmax.f32 %v1329_v56, 0.0  ;;  %v2245_v10 = vmax.f32 %v1385_v23, 0.0  ;;  %v3182_v23 = vcombine.low %v4200_v25, %v4200_v25 }
 0x172   :  { %3358 = vmatprep.subr.bf16.mxu1 %v2486_v26  ;;  %v2485_v32 = vpack.c.bf16 %v2252_v60, %v2251_v24  ;;  %v1425_v42 = vadd.f32 %v4088_v30, %v1424_v62  ;;  %v2257_v53 = vmax.f32 %v1433_v34, 0.0  ;;  %v3947_v24 = vld [vmem:[#allocation2 + $0x2b0] sm:$0xff]   ;;  %v1372_v26 = vadd.f32 %v4211_v38, %v4088_v30 }
 0x173   :  { %v3598_v16 = vpop.f32.mrf.mxu0  ;;  %3359 = vmatpush3.bf16.msra.mxu1 %v2478_v28  ;;  %v2475_v44 = vpack.c.bf16 %v2232_v63, %v2231_v8  ;;  %v2482_v60 = vpack.c.bf16 %v2246_v3, %v2245_v10  ;;  %v3952_v3 = vld [vmem:[#allocation2 + $0x2d8] sm:$0xff]  }
 0x174   :  { %v1436_v43 = vadd.f32 %v3598_v16, %v4088_v30  ;;  %3360 = vmatprep.subr.bf16.mxu1 %v2485_v32  ;;  %v2255_v58 = vmax.f32 %v1425_v42, 0.0  ;;  %v2243_v32 = vmax.f32 %v1377_v12, 0.0  ;;  %v2242_v16 = vmax.f32 %v1372_v26, 0.0  ;;  %v3948_v42 = vld [vmem:[#allocation2 + $0x2b8] sm:$0xff]  }
 0x175   :  { %v1427_v51 = vpop.f32.mrf.mxu0 }
 0x176   :  { %v2258_v54 = vmax.f32 %v1436_v43, 0.0  ;;  %v1428_v18 = vadd.f32 %v4088_v30, %v1427_v51  ;;  %v2481_v36 = vpack.c.bf16 %v2244_v29, %v2243_v32  ;;  %v2241_v43 = vmax.f32 %v1369_v41, 0.0 }
 0x177   :  { %v3601_v57 = vpop.f32.mrf.mxu0  ;;  %3696 = vmatmul.mubr.bf16.gmra.mxu0 %v3944_v46  ;;  %3361 = vmatpush3.bf16.msra.mxu1 %v2477_v48  ;;  %v1364_v46 = vadd.f32 %v4088_v30, %v4213_v40 }
 0x178   :  { %v4251_v49 = vpack.c.bf16 %v2258_v54, %v2257_v53  ;;  %v2256_v59 = vmax.f32 %v1428_v18, 0.0  ;;  %3362 = vmatprep.subr.bf16.mxu1 %v2484_v50  ;;  %3699 = vmatprep.mubr.bf16.mxu0 %v3945_v0  ;;  %v1449_v31 = vadd.f32 %v3601_v57, %v4088_v30  ;;  %v1361_v0 = vadd.f32 %v4088_v30, %v4209_v37  ;;  %v3950_v37 = vld [vmem:[#allocation2 + $0x2c8] sm:$0xff]   ;;  %v3721_v54 = vpop.f32.mrf.mxu1  ;;  %v3951_v18 = vld [vmem:[#allocation2 + $0x2d0] sm:$0xff]  }
 0x179   :  { %v1440_v4 = vpop.f32.mrf.mxu0  ;;  %v2480_v6 = vpack.c.bf16 %v2242_v16, %v2241_v43  ;;  %v2240_v50 = vmax.f32 %v1364_v46, 0.0 }
 0x17a   :  { %v4255_v19 = vpack.c.bf16 %v2256_v59, %v2255_v58  ;;  %v1441_v21 = vadd.f32 %v4088_v30, %v1440_v4  ;;  %v2261_v17 = vmax.f32 %v1449_v31, 0.0  ;;  %v2239_v40 = vmax.f32 %v1361_v0, 0.0  ;;  %v1920_v56 = vpop.f32.mrf.mxu1  ;;  %v3953_v31 = vld [vmem:[#allocation2 + $0x2e0] sm:$0xff]  }
 0x17b   :  { %v3602_v2 = vpop.f32.mrf.mxu0  ;;  %3363 = vmatpush3.bf16.msra.mxu1 %v2476_v61  ;;  %v1929_v58 = vadd.f32 %v3721_v54, %v4088_v30  ;;  %v1921_v4 = vadd.f32 %v4088_v30, %v1920_v56 }
 0x17c   :  { %v1452_v22 = vadd.f32 %v3602_v2, %v4088_v30  ;;  %3364 = vmatprep.subr.bf16.mxu1 %v2483_v7  ;;  %v2259_v13 = vmax.f32 %v1441_v21, 0.0  ;;  %v2479_v52 = vpack.c.bf16 %v2240_v50, %v2239_v40  ;;  %v3722_v27 = vpop.f32.mrf.mxu1 }
 0x17d   :  { %v1443_v28 = vpop.f32.mrf.mxu0  ;;  %v2381_v25 = vmax.f32 %v1929_v58, 0.0  ;;  %v2379_v10 = vmax.f32 %v1921_v4, 0.0 }
 0x17e   :  { %v2262_v62 = vmax.f32 %v1452_v22, 0.0  ;;  %v1444_v33 = vadd.f32 %v4088_v30, %v1443_v28  ;;  %v1923_v61 = vpop.f32.mrf.mxu1 }
 0x17f   :  { %v4267_v34 = vpop.f32.mrf.mxu0  ;;  %3700 = vmatmul.mubr.bf16.gmra.mxu0 %v3946_v11  ;;  %3365 = vmatpush3.bf16.msra.mxu1 %v2475_v44  ;;  %v1924_v7 = vadd.f32 %v4088_v30, %v1923_v61 }
 0x180   :  { %v4269_v35 = vpack.c.bf16 %v2262_v62, %v2261_v17  ;;  %v2260_v1 = vmax.f32 %v1444_v33, 0.0  ;;  %3366 = vmatprep.subr.bf16.mxu1 %v2482_v60  ;;  %3703 = vmatprep.mubr.bf16.mxu0 %v3947_v24  ;;  %v3725_v14 = vpop.f32.mrf.mxu1  ;;  %v3954_v62 = vld [vmem:[#allocation2 + $0x2e8] sm:$0xff]  }
 0x181   :  { %v4271_v38 = vpop.f32.mrf.mxu0  ;;  %v2380_v12 = vmax.f32 %v1924_v7, 0.0  ;;  %v1945_v60 = vadd.f32 %v3725_v14, %v4088_v30 }
 0x182   :  { %v4275_v5 = vpack.c.bf16 %v2260_v1, %v2259_v13  ;;  %v1936_v11 = vpop.f32.mrf.mxu1  ;;  %v4348_v61 = vadd.f32 %v4088_v30, %v4271_v38 }
 0x183   :  { %v4277_v39 = vpop.f32.mrf.mxu0  ;;  %3367 = vmatpush3.bf16.msra.mxu1 %v4180_v9  ;;  %v4320_v44 = vpack.c.bf16 %v2380_v12, %v2379_v10  ;;  %v1937_v29 = vadd.f32 %v4088_v30, %v1936_v11  ;;  %v2385_v33 = vmax.f32 %v1945_v60, 0.0 }
 0x184   :  { %3368 = vmatprep.subr.bf16.mxu1 %v2481_v36  ;;  %v3726_v24 = vpop.f32.mrf.mxu1  ;;  %v2263_v11 = vmax.f32 %v4348_v61, 0.0 }
 0x185   :  { %v4282_v48 = vpop.f32.mrf.mxu0  ;;  %v1948_v41 = vadd.f32 %v3726_v24, %v4088_v30  ;;  %v2383_v13 = vmax.f32 %v1937_v29, 0.0 }
 0x186   :  { %v1939_v28 = vpop.f32.mrf.mxu1  ;;  %v4356_v14 = vadd.f32 %v4088_v30, %v4282_v48 }
 0x187   :  { %v4284_v51 = vpop.f32.mrf.mxu0  ;;  %3704 = vmatmul.mubr.bf16.gmra.mxu0 %v3948_v42  ;;  %3369 = vmatpush3.bf16.msra.mxu1 %v4186_v15  ;;  %v1940_v1 = vadd.f32 %v4088_v30, %v1939_v28  ;;  %v2386_v46 = vmax.f32 %v1948_v41, 0.0 }
 0x188   :  { %3370 = vmatprep.subr.bf16.mxu1 %v2480_v6  ;;  %3707 = vmatprep.mubr.bf16.mxu0 %v3949_v47  ;;  %v3729_v32 = vpop.f32.mrf.mxu1  ;;  %v2264_v29 = vmax.f32 %v4356_v14, 0.0  ;;  %v1481_v41 = vadd.f32 %v4284_v51, %v4088_v30 }
 0x189   :  { %v4287_v9 = vpop.f32.mrf.mxu0  ;;  %v2384_v42 = vmax.f32 %v1940_v1, 0.0  ;;  %v4332_v0 = vpack.c.bf16 %v2386_v46, %v2385_v33  ;;  %v1961_v40 = vadd.f32 %v3729_v32, %v4088_v30 }
 0x18a   :  { %v1952_v36 = vpop.f32.mrf.mxu1 }
 0x18b   :  { %v4289_v53 = vpop.f32.mrf.mxu0  ;;  %3371 = vmatpush3.bf16.msra.mxu1 %v4162_v20  ;;  %v3185_v20 = vcombine.high %v4295_v55, %v4295_v55  ;;  %4880 = vst [vmem:[#allocation8_spill] sm:$0xff] %v4332_v0  ;;  %v4334_v6 = vpack.c.bf16 %v2384_v42, %v2383_v13 }
 0x18c   :  { %3372 = vmatprep.subr.bf16.mxu1 %v2479_v52  ;;  %v3730_v47 = vpop.f32.mrf.mxu1  ;;  %v1484_v12 = vadd.f32 %v4289_v53, %v4088_v30  ;;  %v1473_v53 = vadd.f32 %v4088_v30, %v4287_v9 }
 0x18d   :  { %v4297_v15 = vpop.f32.mrf.mxu0  ;;  %4881 = vst [vmem:[#allocation9_spill] sm:$0xff] %v4334_v6  ;;  %v1964_v56 = vadd.f32 %v3730_v47, %v4088_v30 }
 0x18e   :  { %v1955_v52 = vpop.f32.mrf.mxu1 }
 0x18f   :  { %v4301_v57 = vpop.f32.mrf.mxu0  ;;  %3708 = vmatmul.mubr.bf16.gmra.mxu0 %v3950_v37  ;;  %3373 = vmatpush3.bf16.msra.mxu1 %v4166_v45  ;;  %v1932_v45 = vadd.f32 %v3722_v27, %v4088_v30  ;;  %v1953_v37 = vadd.f32 %v4088_v30, %v1952_v36  ;;  %v1956_v58 = vadd.f32 %v4088_v30, %v1955_v52 }
 0x190   :  { %3711 = vmatprep.mubr.bf16.mxu0 %v3951_v18  ;;  %v2389_v18 = vmax.f32 %v1961_v40, 0.0  ;;  %v2270_v40 = vmax.f32 %v1484_v12, 0.0 }
 0x191   :  { %v4307_v59 = vpop.f32.mrf.mxu0  ;;  %v2382_v2 = vmax.f32 %v1932_v45, 0.0  ;;  %v2387_v27 = vmax.f32 %v1953_v37, 0.0  ;;  %v4352_v45 = vadd.f32 %v4277_v39, %v4088_v30  ;;  %v1476_v39 = vadd.f32 %v4088_v30, %v4297_v15 }
 0x192   :  { %2712 = vmatmul.mubr.bf16.vlgmr.msra.gmra.mxu1 %v3182_v23  ;;  %v3733_v23 = vpop.f32.mrf.mxu1 }
 0x193   :  { %v4309_v63 = vpop.f32.mrf.mxu0  ;;  %2751 = vmatprep.mubr.bf16.mxu1 %v3185_v20  ;;  %v4318_v22 = vpack.c.bf16 %v2382_v2, %v2381_v25  ;;  %v4343_v20 = vadd.f32 %v4267_v34, %v4088_v30  ;;  %v2390_v25 = vmax.f32 %v1964_v56, 0.0  ;;  %v2388_v34 = vmax.f32 %v1956_v58, 0.0 }
 0x194   :  { %v1968_v4 = vpop.f32.mrf.mxu1  ;;  %v1977_v48 = vadd.f32 %v3733_v23, %v4088_v30  ;;  %v2266_v28 = vmax.f32 %v4352_v45, 0.0  ;;  %v2268_v52 = vmax.f32 %v1476_v39, 0.0 }
 0x195   :  { %v4314_v8 = vpop.f32.mrf.mxu0  ;;  %v4358_v7 = vpack.c.bf16 %v2390_v25, %v2389_v18  ;;  %v2265_v2 = vmax.f32 %v4343_v20, 0.0  ;;  %v4361_v38 = vpack.c.bf16 %v2388_v34, %v2387_v27  ;;  %v1969_v33 = vadd.f32 %v4088_v30, %v1968_v4 }
 0x196   :  { %v3734_v10 = vpop.f32.mrf.mxu1  ;;  %v2393_v15 = vmax.f32 %v1977_v48, 0.0  ;;  %v2269_v25 = vmax.f32 %v1481_v41, 0.0  ;;  %v2267_v4 = vmax.f32 %v1473_v53, 0.0  ;;  %v2491_v20 = vpack.c.bf16 %v2264_v29, %v2263_v11 }
 0x197   :  { %v4316_v21 = vpop.f32.mrf.mxu0  ;;  %3712 = vmatmul.mubr.bf16.gmra.mxu0 %v3952_v3  ;;  %4882 = vst [vmem:[#allocation10_spill] sm:$0xff] %v4361_v38  ;;  %v1980_v13 = vadd.f32 %v3734_v10, %v4088_v30  ;;  %v2391_v42 = vmax.f32 %v1969_v33, 0.0 }
 0x198   :  { %3715 = vmatprep.mubr.bf16.mxu0 %v3953_v31  ;;  %v1971_v60 = vpop.f32.mrf.mxu1  ;;  %v2493_v53 = vpack.c.bf16 %v2268_v52, %v2267_v4 }
 0x199   :  { %v4322_v26 = vpop.f32.mrf.mxu0  ;;  %v1972_v47 = vadd.f32 %v4088_v30, %v1971_v60  ;;  %v2394_v18 = vmax.f32 %v1980_v13, 0.0  ;;  %v2494_v60 = vpack.c.bf16 %v2270_v40, %v2269_v25 }
 0x19a   :  { %v3737_v1 = vpop.f32.mrf.mxu1 }
 0x19b   :  { %v4326_v17 = vpop.f32.mrf.mxu0  ;;  %v2392_v58 = vmax.f32 %v1972_v47, 0.0  ;;  %v4384_v10 = vpack.c.bf16 %v2394_v18, %v2393_v15  ;;  %v1993_v13 = vadd.f32 %v3737_v1, %v4088_v30 }
 0x19c   :  { %v1984_v56 = vpop.f32.mrf.mxu1 }
 0x19d   :  { %v4330_v16 = vpop.f32.mrf.mxu0  ;;  %v1985_v15 = vadd.f32 %v4088_v30, %v1984_v56  ;;  %v2397_v40 = vmax.f32 %v1993_v13, 0.0 }
 0x19f   :  { %v3621_v43 = vpop.f32.mrf.mxu0  ;;  %3716 = vmatmul.mubr.bf16.gmra.mxu0 %v3954_v62  ;;  %v2395_v18 = vmax.f32 %v1985_v15, 0.0 }
 0x1a0   :  { %v1529_v34 = vadd.f32 %v3621_v43, %v4088_v30 }
 0x1a1   :  { %v4336_v50 = vpop.f32.mrf.mxu0 }
 0x1a3   :  { %v3622_v54 = vpop.f32.mrf.mxu0 }
 0x1a4   :  { %v1532_v37 = vadd.f32 %v3622_v54, %v4088_v30  ;;  %v4386_v54 = vpack.c.bf16 %v2392_v58, %v2391_v42  ;;  %v1521_v42 = vadd.f32 %v4088_v30, %v4336_v50 }
 0x1a5   :  { %v1523_v3 = vpop.f32.mrf.mxu0 }
 0x1a6   :  { %v2282_v33 = vmax.f32 %v1532_v37, 0.0 }
 0x1a7   :  { %v3625_v31 = vpop.f32.mrf.mxu0 }
 0x1a8   :  { %v1545_v62 = vadd.f32 %v3625_v31, %v4088_v30 }
 0x1a9   :  { %v1536_v24 = vpop.f32.mrf.mxu0 }
 0x1aa   :  { %v1537_v46 = vadd.f32 %v4088_v30, %v1536_v24  ;;  %v2285_v9 = vmax.f32 %v1545_v62, 0.0  ;;  %v3738_v24 = vpop.f32.mrf.mxu1  ;;  %v1524_v62 = vadd.f32 %v4088_v30, %v1523_v3  ;;  %v4397_v3 = vld [vmem:[%s4876_s3] ss:$0 sm:$0xff] }
 0x1ab   :  { %v3626_v32 = vpop.f32.mrf.mxu0  ;;  %v1996_v1 = vadd.f32 %v4397_v3, %v3738_v24  ;;  %v2492_v24 = vpack.c.bf16 %v2266_v28, %v2265_v2  ;;  %v1505_v61 = vadd.f32 %v4397_v3, %v4322_v26 }
 0x1ac   :  { %v1548_v36 = vadd.f32 %v3626_v32, %v4088_v30  ;;  %v2283_v12 = vmax.f32 %v1537_v46, 0.0  ;;  %v1987_v41 = vpop.f32.mrf.mxu1  ;;  %v2281_v46 = vmax.f32 %v1529_v34, 0.0 }
 0x1ad   :  { %v1539_v51 = vpop.f32.mrf.mxu0  ;;  %v1988_v56 = vadd.f32 %v4397_v3, %v1987_v41 }
 0x1ae   :  { %v2286_v23 = vmax.f32 %v1548_v36, 0.0  ;;  %v1540_v27 = vadd.f32 %v4088_v30, %v1539_v51  ;;  %v3741_v52 = vpop.f32.mrf.mxu1  ;;  %v2500_v50 = vpack.c.bf16 %v2282_v33, %v2281_v46 }
 0x1af   :  { %v3629_v31 = vpop.f32.mrf.mxu0  ;;  %v2009_v28 = vadd.f32 %v4397_v3, %v3741_v52  ;;  %v1500_v52 = vadd.f32 %v4397_v3, %v4309_v63 }
 0x1b0   :  { %v2502_v39 = vpack.c.bf16 %v2286_v23, %v2285_v9  ;;  %v2284_v48 = vmax.f32 %v1540_v27, 0.0  ;;  %v1561_v43 = vadd.f32 %v3629_v31, %v4088_v30  ;;  %v1516_v30 = vadd.f32 %v4397_v3, %v4326_v17  ;;  %v2000_v58 = vpop.f32.mrf.mxu1 }
 0x1b1   :  { %v1552_v32 = vpop.f32.mrf.mxu0  ;;  %v2280_v9 = vmax.f32 %v1524_v62, 0.0  ;;  %v2398_v27 = vmax.f32 %v1996_v1, 0.0  ;;  %v2396_v31 = vmax.f32 %v1988_v56, 0.0  ;;  %v2001_v15 = vadd.f32 %v4397_v3, %v2000_v58 }
 0x1b2   :  { %v2501_v36 = vpack.c.bf16 %v2284_v48, %v2283_v12  ;;  %3380 = vmatprep.subr.bf16.mxu1 %v2502_v39  ;;  %v1553_v37 = vadd.f32 %v4397_v3, %v1552_v32  ;;  %v2289_v25 = vmax.f32 %v1561_v43, 0.0  ;;  %v1513_v12 = vadd.f32 %v4397_v3, %v4316_v21 }
 0x1b3   :  { %v3630_v47 = vpop.f32.mrf.mxu0  ;;  %3381 = vmatpush3.bf16.msra.mxu1 %v2494_v60  ;;  %v2279_v39 = vmax.f32 %v1521_v42, 0.0  ;;  %v4412_v48 = vpack.c.bf16 %v2398_v27, %v2397_v40  ;;  %v3742_v60 = vpop.f32.mrf.mxu1  ;;  %v4416_v13 = vpack.c.bf16 %v2396_v31, %v2395_v18  ;;  %v2278_v45 = vmax.f32 %v1516_v30, 0.0 }
 0x1b4   :  { %v1564_v51 = vadd.f32 %v4397_v3, %v3630_v47  ;;  %3382 = vmatprep.subr.bf16.mxu1 %v2501_v36  ;;  %v2287_v33 = vmax.f32 %v1553_v37, 0.0  ;;  %v1508_v21 = vadd.f32 %v4397_v3, %v4330_v16  ;;  %v2277_v46 = vmax.f32 %v1513_v12, 0.0 }
 0x1b5   :  { %v1555_v23 = vpop.f32.mrf.mxu0  ;;  %v2003_v41 = vpop.f32.mrf.mxu1  ;;  %v2401_v11 = vmax.f32 %v2009_v28, 0.0  ;;  %v2012_v16 = vadd.f32 %v4397_v3, %v3742_v60  ;;  %v2399_v40 = vmax.f32 %v2001_v15, 0.0  ;;  %v1497_v27 = vadd.f32 %v4397_v3, %v4301_v57 }
 0x1b6   :  { %v2290_v4 = vmax.f32 %v1564_v51, 0.0  ;;  %v1556_v34 = vadd.f32 %v4397_v3, %v1555_v23  ;;  %v2004_v1 = vadd.f32 %v4397_v3, %v2003_v41  ;;  %v2498_v37 = vpack.c.bf16 %v2278_v45, %v2277_v46 }
 0x1b7   :  { %v3633_v17 = vpop.f32.mrf.mxu0  ;;  %3383 = vmatpush3.bf16.msra.mxu1 %v2493_v53  ;;  %v2499_v53 = vpack.c.bf16 %v2280_v9, %v2279_v39  ;;  %v3745_v29 = vpop.f32.mrf.mxu1  ;;  %v2276_v51 = vmax.f32 %v1508_v21, 0.0  ;;  %v2402_v18 = vmax.f32 %v2012_v16, 0.0  ;;  %v2275_v58 = vmax.f32 %v1505_v61, 0.0 }
 0x1b8   :  { %v4414_v62 = vpack.c.bf16 %v2290_v4, %v2289_v25  ;;  %v2288_v32 = vmax.f32 %v1556_v34, 0.0  ;;  %3384 = vmatprep.subr.bf16.mxu1 %v2500_v50  ;;  %v1577_v43 = vadd.f32 %v4397_v3, %v3633_v17  ;;  %v2400_v23 = vmax.f32 %v2004_v1, 0.0 }
 0x1b9   :  { %v1568_v2 = vpop.f32.mrf.mxu0  ;;  %v2016_v56 = vpop.f32.mrf.mxu1  ;;  %v4442_v4 = vpack.c.bf16 %v2402_v18, %v2401_v11  ;;  %v2274_v39 = vmax.f32 %v1500_v52, 0.0  ;;  %v2025_v60 = vadd.f32 %v4397_v3, %v3745_v29 }
 0x1ba   :  { %v4425_v36 = vpack.c.bf16 %v2288_v32, %v2287_v33  ;;  %v1569_v42 = vadd.f32 %v4397_v3, %v1568_v2  ;;  %v2293_v30 = vmax.f32 %v1577_v43, 0.0  ;;  %v4446_v12 = vpack.c.bf16 %v2400_v23, %v2399_v40 }
 0x1bb   :  { %v3634_v14 = vpop.f32.mrf.mxu0  ;;  %3385 = vmatpush3.bf16.msra.mxu1 %v2492_v24  ;;  %4883 = vst [vmem:[#allocation11_spill] sm:$0xff] %v4442_v4  ;;  %v3746_v63 = vpop.f32.mrf.mxu1  ;;  %v1492_v33 = vadd.f32 %v4397_v3, %v4314_v8  ;;  %v2497_v32 = vpack.c.bf16 %v2276_v51, %v2275_v58  ;;  %v2017_v45 = vadd.f32 %v4397_v3, %v2016_v56  ;;  %v2405_v2 = vmax.f32 %v2025_v60, 0.0 }
 0x1bc   :  { %v1580_v47 = vadd.f32 %v4397_v3, %v3634_v14  ;;  %3386 = vmatprep.subr.bf16.mxu1 %v2499_v53  ;;  %v2291_v34 = vmax.f32 %v1569_v42, 0.0  ;;  %4884 = vst [vmem:[#allocation12_spill] sm:$0xff] %v4446_v12  ;;  %v2028_v28 = vadd.f32 %v4397_v3, %v3746_v63  ;;  %v2273_v53 = vmax.f32 %v1497_v27, 0.0 }
 0x1bd   :  { %v1571_v26 = vpop.f32.mrf.mxu0  ;;  %v2019_v57 = vpop.f32.mrf.mxu1  ;;  %v1489_v43 = vadd.f32 %v4397_v3, %v4307_v59  ;;  %v2403_v15 = vmax.f32 %v2017_v45, 0.0  ;;  %v2272_v16 = vmax.f32 %v1492_v33, 0.0 }
 0x1be   :  { %v2294_v50 = vmax.f32 %v1580_v47, 0.0  ;;  %v1572_v9 = vadd.f32 %v4397_v3, %v1571_v26  ;;  %v2020_v8 = vadd.f32 %v4397_v3, %v2019_v57  ;;  %v2406_v61 = vmax.f32 %v2028_v28, 0.0 }
 0x1bf   :  { %v4440_v25 = vpop.f32.mrf.mxu0  ;;  %3387 = vmatpush3.bf16.msra.mxu1 %v2491_v20  ;;  %v3749_v41 = vpop.f32.mrf.mxu1  ;;  %v2496_v11 = vpack.c.bf16 %v2274_v39, %v2273_v53  ;;  %v2271_v40 = vmax.f32 %v1489_v43, 0.0 }
 0x1c0   :  { %v4444_v31 = vpack.c.bf16 %v2294_v50, %v2293_v30  ;;  %v2292_v24 = vmax.f32 %v1572_v9, 0.0  ;;  %3388 = vmatprep.subr.bf16.mxu1 %v2498_v37  ;;  %v2404_v29 = vmax.f32 %v2020_v8, 0.0  ;;  %v4468_v42 = vpack.c.bf16 %v2406_v61, %v2405_v2  ;;  %v4483_v50 = vld [vmem:[%s4874_s1 + $0x18] sm:$0xff] }
 0x1c1   :  { %v4448_v17 = vpop.f32.mrf.mxu0  ;;  %v2032_v14 = vpop.f32.mrf.mxu1  ;;  %v2041_v52 = vadd.f32 %v4397_v3, %v3749_v41  ;;  %v2495_v51 = vpack.c.bf16 %v2272_v16, %v2271_v40  ;;  %v3187_v39 = vcombine.high %v4483_v50, %v4483_v50 }
 0x1c2   :  { %v4453_v20 = vpack.c.bf16 %v2292_v24, %v2291_v34  ;;  %v4470_v59 = vpack.c.bf16 %v2404_v29, %v2403_v15  ;;  %v2033_v26 = vadd.f32 %v4397_v3, %v2032_v14 }
 0x1c3   :  { %v4456_v21 = vpop.f32.mrf.mxu0  ;;  %3389 = vmatpush3.bf16.msra.mxu1 %v4269_v35  ;;  %v3750_v47 = vpop.f32.mrf.mxu1 }
 0x1c4   :  { %3390 = vmatprep.subr.bf16.mxu1 %v2497_v32  ;;  %v2044_v56 = vadd.f32 %v4397_v3, %v3750_v47  ;;  %v2407_v9 = vmax.f32 %v2033_v26, 0.0 }
 0x1c5   :  { %v4463_v46 = vpop.f32.mrf.mxu0  ;;  %v2035_v37 = vpop.f32.mrf.mxu1 }
 0x1c6   :  { %v2036_v23 = vadd.f32 %v4397_v3, %v2035_v37  ;;  %v2410_v58 = vmax.f32 %v2044_v56, 0.0 }
 0x1c7   :  { %v4465_v35 = vpop.f32.mrf.mxu0  ;;  %3391 = vmatpush3.bf16.msra.mxu1 %v4275_v5  ;;  %v2409_v5 = vmax.f32 %v2041_v52, 0.0  ;;  %v3753_v30 = vpop.f32.mrf.mxu1 }
 0x1c8   :  { %3392 = vmatprep.subr.bf16.mxu1 %v2496_v11  ;;  %v2408_v34 = vmax.f32 %v2036_v23, 0.0  ;;  %v2057_v45 = vadd.f32 %v4397_v3, %v3753_v30 }
 0x1c9   :  { %v4472_v1 = vpop.f32.mrf.mxu0  ;;  %v2048_v63 = vpop.f32.mrf.mxu1  ;;  %v4495_v60 = vpack.c.bf16 %v2410_v58, %v2409_v5 }
 0x1ca   :  { %v4497_v33 = vpack.c.bf16 %v2408_v34, %v2407_v9 }
 0x1cb   :  { %v4476_v18 = vpop.f32.mrf.mxu0  ;;  %3393 = vmatpush3.bf16.msra.mxu1 %v4251_v49  ;;  %v3184_v49 = vcombine.low %v4295_v55, %v4295_v55  ;;  %v3754_v57 = vpop.f32.mrf.mxu1  ;;  %v2049_v55 = vadd.f32 %v4397_v3, %v2048_v63 }
 0x1cc   :  { %3394 = vmatprep.subr.bf16.mxu1 %v2495_v51  ;;  %v2060_v41 = vadd.f32 %v4397_v3, %v3754_v57 }
 0x1cd   :  { %v4486_v27 = vpop.f32.mrf.mxu0  ;;  %v2051_v2 = vpop.f32.mrf.mxu1  ;;  %v2411_v43 = vmax.f32 %v2049_v55, 0.0 }
 0x1ce   :  { %v2052_v15 = vadd.f32 %v4397_v3, %v2051_v2  ;;  %v2414_v61 = vmax.f32 %v2060_v41, 0.0 }
 0x1cf   :  { %v4490_v24 = vpop.f32.mrf.mxu0  ;;  %3395 = vmatpush3.bf16.msra.mxu1 %v4255_v19  ;;  %v2413_v19 = vmax.f32 %v2057_v45, 0.0  ;;  %v3757_v53 = vpop.f32.mrf.mxu1 }
 0x1d0   :  { %v2412_v11 = vmax.f32 %v2052_v15, 0.0  ;;  %v2073_v37 = vadd.f32 %v4397_v3, %v3757_v53 }
 0x1d1   :  { %v4499_v32 = vpop.f32.mrf.mxu0  ;;  %v2064_v14 = vpop.f32.mrf.mxu1  ;;  %v4511_v29 = vpack.c.bf16 %v2414_v61, %v2413_v19 }
 0x1d2   :  { %2752 = vmatmul.mubr.bf16.vlgmr.msra.gmra.mxu1 %v3184_v49  ;;  %v4513_v40 = vpack.c.bf16 %v2412_v11, %v2411_v43  ;;  %v2065_v26 = vadd.f32 %v4397_v3, %v2064_v14  ;;  %v2417_v56 = vmax.f32 %v2073_v37, 0.0 }
 0x1d3   :  { %v4503_v28 = vpop.f32.mrf.mxu0  ;;  %2791 = vmatprep.mubr.bf16.mxu1 %v3187_v39  ;;  %v3758_v47 = vpop.f32.mrf.mxu1 }
 0x1d4   :  { %v2076_v30 = vadd.f32 %v4397_v3, %v3758_v47  ;;  %v2415_v23 = vmax.f32 %v2065_v26, 0.0  ;;  %v4536_v47 = vadd.f32 %v4397_v3, %v4440_v25  ;;  %v4541_v26 = vadd.f32 %v4397_v3, %v4448_v17 }
 0x1d5   :  { %v4507_v8 = vpop.f32.mrf.mxu0  ;;  %v2067_v51 = vpop.f32.mrf.mxu1  ;;  %v1609_v25 = vadd.f32 %v4397_v3, %v4465_v35 }
 0x1d6   :  { %v2068_v58 = vadd.f32 %v4397_v3, %v2067_v51  ;;  %v2418_v49 = vmax.f32 %v2076_v30, 0.0  ;;  %v4549_v30 = vadd.f32 %v4397_v3, %v4463_v46 }
 0x1d7   :  { %v4509_v16 = vpop.f32.mrf.mxu0  ;;  %v3761_v9 = vpop.f32.mrf.mxu1 }
 0x1d8   :  { %v2416_v39 = vmax.f32 %v2068_v58, 0.0  ;;  %v4525_v45 = vpack.c.bf16 %v2418_v49, %v2417_v56  ;;  %v2089_v41 = vadd.f32 %v4397_v3, %v3761_v9  ;;  %v4545_v56 = vadd.f32 %v4397_v3, %v4456_v21 }
 0x1d9   :  { %v4515_v52 = vpop.f32.mrf.mxu0  ;;  %v2080_v34 = vpop.f32.mrf.mxu1  ;;  %v4555_v49 = vadd.f32 %v4397_v3, %v4472_v1 }
 0x1da   :  { %4885 = vst [vmem:[#allocation13_spill] sm:$0xff] %v4525_v45  ;;  %v4527_v55 = vpack.c.bf16 %v2416_v39, %v2415_v23  ;;  %v2081_v43 = vadd.f32 %v4397_v3, %v2080_v34  ;;  %v2421_v61 = vmax.f32 %v2089_v41, 0.0  ;;  %v1612_v34 = vadd.f32 %v4397_v3, %v4476_v18 }
 0x1db   :  { %v4519_v5 = vpop.f32.mrf.mxu0  ;;  %v3762_v2 = vpop.f32.mrf.mxu1  ;;  %v2299_v18 = vmax.f32 %v4555_v49, 0.0 }
 0x1dc   :  { %4886 = vst [vmem:[#allocation14_spill] sm:$0xff] %v4527_v55  ;;  %v2092_v14 = vadd.f32 %v4397_v3, %v3762_v2  ;;  %v2419_v37 = vmax.f32 %v2081_v43, 0.0  ;;  %v2301_v55 = vmax.f32 %v1609_v25, 0.0  ;;  %v2302_v46 = vmax.f32 %v1612_v34, 0.0 }
 0x1dd   :  { %v4523_v63 = vpop.f32.mrf.mxu0  ;;  %v2083_v53 = vpop.f32.mrf.mxu1  ;;  %v1604_v43 = vadd.f32 %v4397_v3, %v4486_v27 }
 0x1de   :  { %v2084_v51 = vadd.f32 %v4397_v3, %v2083_v53  ;;  %v2422_v23 = vmax.f32 %v2092_v14, 0.0  ;;  %v2510_v27 = vpack.c.bf16 %v2302_v46, %v2301_v55 }
 0x1df   :  { %v3653_v57 = vpop.f32.mrf.mxu0  ;;  %v3765_v11 = vpop.f32.mrf.mxu1 }
 0x1e0   :  { %v2420_v17 = vmax.f32 %v2084_v51, 0.0  ;;  %v4559_v39 = vpack.c.bf16 %v2422_v23, %v2421_v61  ;;  %v2105_v14 = vadd.f32 %v4397_v3, %v3765_v11 }
 0x1e1   :  { %v4529_v19 = vpop.f32.mrf.mxu0  ;;  %v2096_v58 = vpop.f32.mrf.mxu1 }
 0x1e2   :  { %4887 = vst [vmem:[#allocation15_spill] sm:$0xff] %v4559_v39  ;;  %v4562_v41 = vpack.c.bf16 %v2420_v17, %v2419_v37  ;;  %v2097_v23 = vadd.f32 %v4397_v3, %v2096_v58  ;;  %v2425_v17 = vmax.f32 %v2105_v14, 0.0 }
 0x1e3   :  { %v3654_v15 = vpop.f32.mrf.mxu0  ;;  %v3766_v2 = vpop.f32.mrf.mxu1 }
 0x1e4   :  { %4888 = vst [vmem:[#allocation16_spill] sm:$0xff] %v4562_v41  ;;  %v2108_v53 = vadd.f32 %v4397_v3, %v3766_v2  ;;  %v2423_v49 = vmax.f32 %v2097_v23, 0.0 }
 0x1e5   :  { %v1651_v9 = vpop.f32.mrf.mxu0  ;;  %v2099_v51 = vpop.f32.mrf.mxu1 }
 0x1e6   :  { %v2100_v35 = vadd.f32 %v4397_v3, %v2099_v51  ;;  %v2426_v58 = vmax.f32 %v2108_v53, 0.0  ;;  %v2300_v53 = vmax.f32 %v1604_v43, 0.0 }
 0x1e7   :  { %v3657_v21 = vpop.f32.mrf.mxu0  ;;  %v3769_v45 = vpop.f32.mrf.mxu1 }
 0x1e8   :  { %v1673_v61 = vadd.f32 %v4397_v3, %v3657_v21  ;;  %v1660_v21 = vadd.f32 %v4397_v3, %v3654_v15  ;;  %v2424_v34 = vmax.f32 %v2100_v35, 0.0  ;;  %v2121_v14 = vadd.f32 %v4397_v3, %v3769_v45 }
 0x1e9   :  { %v1664_v1 = vpop.f32.mrf.mxu0  ;;  %v2112_v39 = vpop.f32.mrf.mxu1 }
 0x1ea   :  { %v1665_v11 = vadd.f32 %v4397_v3, %v1664_v1  ;;  %v2317_v2 = vmax.f32 %v1673_v61, 0.0  ;;  %v2113_v12 = vadd.f32 %v4397_v3, %v2112_v39  ;;  %v1657_v1 = vadd.f32 %v4397_v3, %v3653_v57 }
 0x1eb   :  { %v3658_v37 = vpop.f32.mrf.mxu0  ;;  %v4584_v23 = vpack.c.bf16 %v2424_v34, %v2423_v49  ;;  %v3770_v15 = vpop.f32.mrf.mxu1  ;;  %v2314_v38 = vmax.f32 %v1660_v21, 0.0  ;;  %v1652_v61 = vadd.f32 %v4397_v3, %v1651_v9  ;;  %v2509_v34 = vpack.c.bf16 %v2300_v53, %v2299_v18 }
 0x1ec   :  { %v1676_v25 = vadd.f32 %v4397_v3, %v3658_v37  ;;  %v4582_v37 = vpack.c.bf16 %v2426_v58, %v2425_v17  ;;  %v2315_v35 = vmax.f32 %v1665_v11, 0.0  ;;  %v2124_v39 = vadd.f32 %v4397_v3, %v3770_v15 }
 0x1ed   :  { %v1667_v41 = vpop.f32.mrf.mxu0  ;;  %4890 = vst [vmem:[#allocation18_spill] sm:$0xff] %v4584_v23  ;;  %v2115_v55 = vpop.f32.mrf.mxu1  ;;  %v2427_v17 = vmax.f32 %v2113_v12, 0.0  ;;  %v2313_v58 = vmax.f32 %v1657_v1, 0.0  ;;  %v1641_v53 = vadd.f32 %v4397_v3, %v4509_v16  ;;  %v4893_v16 = vmax.f32 %v4541_v26, 0.0 }
 0x1ee   :  { %v2318_v6 = vmax.f32 %v1676_v25, 0.0  ;;  %v1668_v51 = vadd.f32 %v4397_v3, %v1667_v41  ;;  %4889 = vst [vmem:[#allocation17_spill] sm:$0xff] %v4582_v37  ;;  %v2429_v41 = vmax.f32 %v2121_v14, 0.0  ;;  %v2116_v49 = vadd.f32 %v4397_v3, %v2115_v55 }
 0x1ef   :  { %v3661_v0 = vpop.f32.mrf.mxu0  ;;  %v2430_v9 = vmax.f32 %v2124_v39, 0.0  ;;  %v3773_v21 = vpop.f32.mrf.mxu1  ;;  %v2516_v12 = vpack.c.bf16 %v2314_v38, %v2313_v58 }
 0x1f0   :  { %v2518_v4 = vpack.c.bf16 %v2318_v6, %v2317_v2  ;;  %v2316_v45 = vmax.f32 %v1668_v51, 0.0  ;;  %v1689_v57 = vadd.f32 %v4397_v3, %v3661_v0  ;;  %v1649_v6 = vadd.f32 %v4397_v3, %v4529_v19 }
 0x1f1   :  { %v1680_v25 = vpop.f32.mrf.mxu0  ;;  %v2428_v2 = vmax.f32 %v2116_v49, 0.0  ;;  %v2137_v0 = vadd.f32 %v4397_v3, %v3773_v21  ;;  %v2312_v51 = vmax.f32 %v1652_v61, 0.0  ;;  %v4597_v19 = vpack.c.bf16 %v2430_v9, %v2429_v41  ;;  %v2128_v15 = vpop.f32.mrf.mxu1 }
 0x1f2   :  { %v2517_v46 = vpack.c.bf16 %v2316_v45, %v2315_v35  ;;  %3402 = vmatprep.subr.bf16.mxu1 %v2518_v4  ;;  %v1681_v43 = vadd.f32 %v4397_v3, %v1680_v25  ;;  %v1644_v4 = vadd.f32 %v4397_v3, %v4519_v5  ;;  %v2321_v35 = vmax.f32 %v1689_v57, 0.0 }
 0x1f3   :  { %v3662_v11 = vpop.f32.mrf.mxu0  ;;  %3403 = vmatpush3.bf16.msra.mxu1 %v2510_v27  ;;  %v4600_v18 = vpack.c.bf16 %v2428_v2, %v2427_v17  ;;  %v2311_v25 = vmax.f32 %v1649_v6, 0.0  ;;  %v2129_v38 = vadd.f32 %v4397_v3, %v2128_v15  ;;  %v3774_v5 = vpop.f32.mrf.mxu1  ;;  %v4891_v17 = vmax.f32 %v4536_v47, 0.0 }
 0x1f4   :  { %v1692_v14 = vadd.f32 %v4397_v3, %v3662_v11  ;;  %3404 = vmatprep.subr.bf16.mxu1 %v2517_v46  ;;  %v2319_v39 = vmax.f32 %v1681_v43, 0.0  ;;  %v2433_v46 = vmax.f32 %v2137_v0, 0.0  ;;  %v2140_v57 = vadd.f32 %v4397_v3, %v3774_v5 }
 0x1f5   :  { %v1683_v1 = vpop.f32.mrf.mxu0  ;;  %v4892_v49 = vmax.f32 %v4545_v56, 0.0  ;;  %v4894_v6 = vmax.f32 %v4549_v30, 0.0  ;;  %v2310_v11 = vmax.f32 %v1644_v4, 0.0  ;;  %v1636_v9 = vadd.f32 %v4397_v3, %v4523_v63 }
 0x1f6   :  { %v2322_v27 = vmax.f32 %v1692_v14, 0.0  ;;  %v1684_v45 = vadd.f32 %v4397_v3, %v1683_v1  ;;  %v2515_v14 = vpack.c.bf16 %v2312_v51, %v2311_v25  ;;  %v2434_v47 = vmax.f32 %v2140_v57, 0.0 }
 0x1f7   :  { %v3665_v55 = vpop.f32.mrf.mxu0  ;;  %3405 = vmatpush3.bf16.msra.mxu1 %v2509_v34  ;;  %v2508_v58 = vpack.c.bf16 %v4892_v49, %v4891_v17  ;;  %v2507_v43 = vpack.c.bf16 %v4894_v6, %v4893_v16  ;;  %v2131_v34 = vpop.f32.mrf.mxu1  ;;  %v1628_v56 = vadd.f32 %v4397_v3, %v4503_v28  ;;  %v2431_v30 = vmax.f32 %v2129_v38, 0.0 }
 0x1f8   :  { %v4605_v61 = vpack.c.bf16 %v2322_v27, %v2321_v35  ;;  %v2320_v41 = vmax.f32 %v1684_v45, 0.0  ;;  %3406 = vmatprep.subr.bf16.mxu1 %v2516_v12  ;;  %v1705_v0 = vadd.f32 %v4397_v3, %v3665_v55  ;;  %v2309_v12 = vmax.f32 %v1641_v53, 0.0 }
 0x1f9   :  { %v1696_v21 = vpop.f32.mrf.mxu0  ;;  %v2132_v4 = vadd.f32 %v4397_v3, %v2131_v34  ;;  %v3777_v1 = vpop.f32.mrf.mxu1  ;;  %v1633_v63 = vadd.f32 %v4397_v3, %v4515_v52  ;;  %v4628_v35 = vpack.c.bf16 %v2434_v47, %v2433_v46  ;;  %v2308_v45 = vmax.f32 %v1636_v9, 0.0 }
 0x1fa   :  { %v4618_v2 = vpack.c.bf16 %v2320_v41, %v2319_v39  ;;  %v1697_v51 = vadd.f32 %v4397_v3, %v1696_v21  ;;  %v2514_v27 = vpack.c.bf16 %v2310_v11, %v2309_v12  ;;  %v2153_v25 = vadd.f32 %v4397_v3, %v3777_v1 }
 0x1fb   :  { %v3666_v26 = vpop.f32.mrf.mxu0  ;;  %3407 = vmatpush3.bf16.msra.mxu1 %v2508_v58  ;;  %4895 = vst [vmem:[#allocation19_spill] sm:$0xff] %v4628_v35  ;;  %v2432_v53 = vmax.f32 %v2132_v4, 0.0  ;;  %v2144_v39 = vpop.f32.mrf.mxu1  ;;  %v2325_v55 = vmax.f32 %v1705_v0, 0.0  ;;  %v1625_v41 = vadd.f32 %v4397_v3, %v4490_v24  ;;  %v2307_v49 = vmax.f32 %v1633_v63, 0.0 }
 0x1fc   :  { %v1708_v15 = vadd.f32 %v4397_v3, %v3666_v26  ;;  %3408 = vmatprep.subr.bf16.mxu1 %v2515_v14  ;;  %v2145_v52 = vadd.f32 %v4397_v3, %v2144_v39  ;;  %v2323_v58 = vmax.f32 %v1697_v51, 0.0  ;;  %v2306_v11 = vmax.f32 %v1628_v56, 0.0 }
 0x1fd   :  { %v1699_v28 = vpop.f32.mrf.mxu0  ;;  %v4637_v46 = vpack.c.bf16 %v2432_v53, %v2431_v30  ;;  %v3778_v17 = vpop.f32.mrf.mxu1  ;;  %v1620_v9 = vadd.f32 %v4397_v3, %v4507_v8  ;;  %v2437_v34 = vmax.f32 %v2153_v25, 0.0  ;;  %v2305_v4 = vmax.f32 %v1625_v41, 0.0 }
 0x1fe   :  { %v2326_v38 = vmax.f32 %v1708_v15, 0.0  ;;  %v1700_v5 = vadd.f32 %v4397_v3, %v1699_v28  ;;  %v2156_v24 = vadd.f32 %v4397_v3, %v3778_v17  ;;  %v2435_v47 = vmax.f32 %v2145_v52, 0.0 }
 0x1ff   :  { %v4635_v57 = vpop.f32.mrf.mxu0  ;;  %3409 = vmatpush3.bf16.msra.mxu1 %v2507_v43  ;;  %4896 = vst [vmem:[#allocation20_spill] sm:$0xff] %v4637_v46  ;;  %v2147_v14 = vpop.f32.mrf.mxu1  ;;  %v2513_v43 = vpack.c.bf16 %v2308_v45, %v2307_v49  ;;  %v1617_v8 = vadd.f32 %v4397_v3, %v4499_v32  ;;  %v2512_v45 = vpack.c.bf16 %v2306_v11, %v2305_v4  ;;  %v2304_v28 = vmax.f32 %v1620_v9, 0.0  ;;  %v4671_v11 = vld [vmem:[%s4874_s1 + $0x20] sm:$0xff] }
 0x200   :  { %v4639_v16 = vpack.c.bf16 %v2326_v38, %v2325_v55  ;;  %v2324_v6 = vmax.f32 %v1700_v5, 0.0  ;;  %3410 = vmatprep.subr.bf16.mxu1 %v2514_v27  ;;  %v2148_v12 = vadd.f32 %v4397_v3, %v2147_v14  ;;  %v2438_v56 = vmax.f32 %v2156_v24, 0.0 }
 0x201   :  { %v4643_v21 = vpop.f32.mrf.mxu0  ;;  %v3781_v30 = vpop.f32.mrf.mxu1  ;;  %v2303_v32 = vmax.f32 %v1617_v8, 0.0 }
 0x202   :  { %v4646_v0 = vpack.c.bf16 %v2324_v6, %v2323_v58  ;;  %v2436_v1 = vmax.f32 %v2148_v12, 0.0  ;;  %v2169_v63 = vadd.f32 %v4397_v3, %v3781_v30  ;;  %v4657_v15 = vpack.c.bf16 %v2438_v56, %v2437_v34 }
 0x203   :  { %v4649_v26 = vpop.f32.mrf.mxu0  ;;  %3411 = vmatpush3.bf16.msra.mxu1 %v4444_v31  ;;  %v2160_v27 = vpop.f32.mrf.mxu1  ;;  %v2511_v41 = vpack.c.bf16 %v2304_v28, %v2303_v32  ;;  %v3189_v56 = vcombine.high %v4671_v11, %v4671_v11 }
 0x204   :  { %3412 = vmatprep.subr.bf16.mxu1 %v2513_v43  ;;  %4897 = vst [vmem:[#allocation21_spill] sm:$0xff] %v4657_v15  ;;  %v4659_v53 = vpack.c.bf16 %v2436_v1, %v2435_v47  ;;  %v2161_v25 = vadd.f32 %v4397_v3, %v2160_v27  ;;  %v2441_v55 = vmax.f32 %v2169_v63, 0.0 }
 0x205   :  { %v4655_v51 = vpop.f32.mrf.mxu0  ;;  %v3782_v39 = vpop.f32.mrf.mxu1 }
 0x206   :  { %4898 = vst [vmem:[#allocation22_spill] sm:$0xff] %v4659_v53  ;;  %v2172_v38 = vadd.f32 %v4397_v3, %v3782_v39  ;;  %v2439_v58 = vmax.f32 %v2161_v25, 0.0 }
 0x207   :  { %v3673_v31 = vpop.f32.mrf.mxu0  ;;  %3413 = vmatpush3.bf16.msra.mxu1 %v4453_v20  ;;  %v2163_v52 = vpop.f32.mrf.mxu1 }
 0x208   :  { %3414 = vmatprep.subr.bf16.mxu1 %v2512_v45  ;;  %v2442_v17 = vmax.f32 %v2172_v38, 0.0  ;;  %v2164_v6 = vadd.f32 %v4397_v3, %v2163_v52 }
 0x209   :  { %v4664_v5 = vpop.f32.mrf.mxu0  ;;  %v3785_v20 = vpop.f32.mrf.mxu1 }
 0x20a   :  { %v4673_v9 = vpack.c.bf16 %v2442_v17, %v2441_v55  ;;  %v2440_v24 = vmax.f32 %v2164_v6, 0.0  ;;  %v2185_v14 = vadd.f32 %v4397_v3, %v3785_v20 }
 0x20b   :  { %v3674_v49 = vpop.f32.mrf.mxu0  ;;  %3415 = vmatpush3.bf16.msra.mxu1 %v4414_v62  ;;  %v2176_v43 = vpop.f32.mrf.mxu1  ;;  %v3186_v62 = vcombine.low %v4483_v50, %v4483_v50 }
 0x20c   :  { %3416 = vmatprep.subr.bf16.mxu1 %v2511_v41  ;;  %4899 = vst [vmem:[#allocation23_spill] sm:$0xff] %v4673_v9  ;;  %v2177_v47 = vadd.f32 %v4397_v3, %v2176_v43  ;;  %v4684_v30 = vpack.c.bf16 %v2440_v24, %v2439_v58  ;;  %v2445_v1 = vmax.f32 %v2185_v14, 0.0 }
 0x20d   :  { %v1731_v34 = vpop.f32.mrf.mxu0  ;;  %v3786_v4 = vpop.f32.mrf.mxu1 }
 0x20e   :  { %4900 = vst [vmem:[#allocation24_spill] sm:$0xff] %v4684_v30  ;;  %v2188_v63 = vadd.f32 %v4397_v3, %v3786_v4  ;;  %v2443_v50 = vmax.f32 %v2177_v47, 0.0 }
 0x20f   :  { %v4679_v12 = vpop.f32.mrf.mxu0  ;;  %3417 = vmatpush3.bf16.msra.mxu1 %v4425_v36  ;;  %v2179_v27 = vpop.f32.mrf.mxu1 }
 0x210   :  { %v2180_v45 = vadd.f32 %v4397_v3, %v2179_v27  ;;  %v2446_v36 = vmax.f32 %v2188_v63, 0.0 }
 0x211   :  { %v4686_v8 = vpop.f32.mrf.mxu0 }
 0x212   :  { %2792 = vmatmul.mubr.bf16.vlgmr.msra.gmra.mxu1 %v3186_v62  ;;  %v3352_v25 = vpop.f32.mrf.mxu1  ;;  %v2444_v39 = vmax.f32 %v2180_v45, 0.0  ;;  %v4694_v55 = vpack.c.bf16 %v2446_v36, %v2445_v1  ;;  %v1740_v1 = vadd.f32 %v4397_v3, %v3674_v49 }
 0x213   :  { %v4690_v28 = vpop.f32.mrf.mxu0  ;;  %2831 = vmatprep.mubr.bf16.mxu1 %v3189_v56 }
 0x214   :  { %v3353_v38 = vpop.f32.mrf.mxu1  ;;  %v4696_v52 = vpack.c.bf16 %v2444_v39, %v2443_v50  ;;  %v1737_v50 = vadd.f32 %v4397_v3, %v3673_v31  ;;  %v2334_v39 = vmax.f32 %v1740_v1, 0.0 }
 0x215   :  { %v4692_v32 = vpop.f32.mrf.mxu0  ;;  %v4698_v41 = vadd.f32 %v3353_v38, %v3352_v25  ;;  %v1732_v38 = vadd.f32 %v4397_v3, %v1731_v34 }
 0x216   :  { %v3355_v58 = vpop.f32.mrf.mxu1  ;;  %v2333_v53 = vmax.f32 %v1737_v50, 0.0 }
 0x217   :  { %v3681_v17 = vpop.f32.mrf.mxu0 }
 0x218   :  { %v3356_v20 = vpop.f32.mrf.mxu1  ;;  %v2526_v23 = vpack.c.bf16 %v2334_v39, %v2333_v53 }
 0x219   :  { %v4700_v6 = vpop.f32.mrf.mxu0 }
 0x21b   :  { %v3682_v24 = vpop.f32.mrf.mxu0 }
 0x21d   :  { %v4702_v14 = vpop.f32.mrf.mxu0 }
 0x21f   :  { %v3685_v43 = vpop.f32.mrf.mxu0 }
 0x220   :  { %v1785_v31 = vadd.f32 %v4397_v3, %v3685_v43 }
 0x221   :  { %v1776_v62 = vpop.f32.mrf.mxu0 }
 0x222   :  { %v2345_v37 = vmax.f32 %v1785_v31, 0.0 }
 0x223   :  { %v3686_v47 = vpop.f32.mrf.mxu0 }
 0x224   :  { %v1788_v58 = vadd.f32 %v4397_v3, %v3686_v47  ;;  %v2332_v47 = vmax.f32 %v1732_v38, 0.0 }
 0x225   :  { %v1779_v56 = vpop.f32.mrf.mxu0 }
 0x226   :  { %v2346_v30 = vmax.f32 %v1788_v58, 0.0 }
 0x227   :  { %v3689_v4 = vpop.f32.mrf.mxu0 }
 0x228   :  { %v1801_v27 = vadd.f32 %v4397_v3, %v3689_v4  ;;  %v1729_v4 = vadd.f32 %v4397_v3, %v4664_v5  ;;  %v1721_v5 = vadd.f32 %v4397_v3, %v4635_v57  ;;  %v2532_v39 = vpack.c.bf16 %v2346_v30, %v2345_v37 }
 0x229   :  { %v1792_v63 = vpop.f32.mrf.mxu0 }
 0x22a   :  { %v1793_v36 = vadd.f32 %v4397_v3, %v1792_v63  ;;  %v2349_v46 = vmax.f32 %v1801_v27, 0.0  ;;  %v1724_v63 = vadd.f32 %v4397_v3, %v4649_v26  ;;  %v2331_v43 = vmax.f32 %v1729_v4, 0.0 }
 0x22b   :  { %v3690_v45 = vpop.f32.mrf.mxu0  ;;  %v2329_v4 = vmax.f32 %v1721_v5, 0.0 }
 0x22c   :  { %v1804_v25 = vadd.f32 %v4397_v3, %v3690_v45  ;;  %v2347_v1 = vmax.f32 %v1793_v36, 0.0  ;;  %v2330_v26 = vmax.f32 %v1724_v63, 0.0  ;;  %v1772_v36 = vadd.f32 %v4397_v3, %v3682_v24 }
 0x22d   :  { %v1795_v20 = vpop.f32.mrf.mxu0 }
 0x22e   :  { %v2350_v35 = vmax.f32 %v1804_v25, 0.0  ;;  %v1796_v49 = vadd.f32 %v4397_v3, %v1795_v20  ;;  %v1780_v25 = vadd.f32 %v4397_v3, %v1779_v56  ;;  %v1716_v56 = vadd.f32 %v4397_v3, %v4655_v51 }
 0x22f   :  { %v3693_v15 = vpop.f32.mrf.mxu0  ;;  %v2524_v30 = vpack.c.bf16 %v2330_v26, %v2329_v4  ;;  %v1756_v26 = vadd.f32 %v4397_v3, %v4690_v28 }
 0x230   :  { %v2534_v45 = vpack.c.bf16 %v2350_v35, %v2349_v46  ;;  %v2348_v34 = vmax.f32 %v1796_v49, 0.0  ;;  %v1817_v50 = vadd.f32 %v4397_v3, %v3693_v15  ;;  %v1777_v35 = vadd.f32 %v4397_v3, %v1776_v62 }
 0x231   :  { %v1808_v27 = vpop.f32.mrf.mxu0  ;;  %v2525_v15 = vpack.c.bf16 %v2332_v47, %v2331_v43  ;;  %v2344_v38 = vmax.f32 %v1780_v25, 0.0  ;;  %v1713_v62 = vadd.f32 %v4397_v3, %v4643_v21  ;;  %v2328_v24 = vmax.f32 %v1716_v56, 0.0 }
 0x232   :  { %v2533_v20 = vpack.c.bf16 %v2348_v34, %v2347_v1  ;;  %3424 = vmatprep.subr.bf16.mxu1 %v2534_v45  ;;  %v1809_v46 = vadd.f32 %v4397_v3, %v1808_v27  ;;  %v2353_v58 = vmax.f32 %v1817_v50, 0.0  ;;  %v2343_v51 = vmax.f32 %v1777_v35, 0.0 }
 0x233   :  { %v3694_v9 = vpop.f32.mrf.mxu0  ;;  %3425 = vmatpush3.bf16.msra.mxu1 %v2526_v23  ;;  %v2342_v34 = vmax.f32 %v1772_v36, 0.0  ;;  %v1764_v47 = vadd.f32 %v4397_v3, %v4702_v14  ;;  %v1761_v50 = vadd.f32 %v4397_v3, %v4700_v6  ;;  %v2338_v6 = vmax.f32 %v1756_v26, 0.0 }
 0x234   :  { %v1820_v53 = vadd.f32 %v4397_v3, %v3694_v9  ;;  %3426 = vmatprep.subr.bf16.mxu1 %v2533_v20  ;;  %v1769_v9 = vadd.f32 %v4397_v3, %v3681_v17  ;;  %v2351_v63 = vmax.f32 %v1809_v46, 0.0  ;;  %v2531_v21 = vpack.c.bf16 %v2344_v38, %v2343_v51 }
 0x235   :  { %v1811_v57 = vpop.f32.mrf.mxu0  ;;  %v2327_v17 = vmax.f32 %v1713_v62, 0.0  ;;  %v2340_v14 = vmax.f32 %v1764_v47, 0.0  ;;  %v2339_v56 = vmax.f32 %v1761_v50, 0.0  ;;  %v1748_v36 = vadd.f32 %v4397_v3, %v4692_v32 }
 0x236   :  { %v2354_v49 = vmax.f32 %v1820_v53, 0.0  ;;  %v1812_v23 = vadd.f32 %v4397_v3, %v1811_v57  ;;  %v2341_v20 = vmax.f32 %v1769_v9, 0.0  ;;  %v1753_v53 = vadd.f32 %v4397_v3, %v4679_v12 }
 0x237   :  { %v4731_v31 = vpop.f32.mrf.mxu0  ;;  %3427 = vmatpush3.bf16.msra.mxu1 %v2525_v15  ;;  %v2523_v5 = vpack.c.bf16 %v2328_v24, %v2327_v17  ;;  %v1745_v38 = vadd.f32 %v4397_v3, %v4686_v8  ;;  %v2336_v12 = vmax.f32 %v1748_v36, 0.0  ;;  %v4767_v8 = vld [vmem:[%s4874_s1 + $0x28] sm:$0xff] }
 0x238   :  { %v4733_v1 = vpack.c.bf16 %v2354_v49, %v2353_v58  ;;  %v2352_v37 = vmax.f32 %v1812_v23, 0.0  ;;  %3428 = vmatprep.subr.bf16.mxu1 %v2532_v39  ;;  %v2530_v35 = vpack.c.bf16 %v2342_v34, %v2341_v20  ;;  %v2529_v39 = vpack.c.bf16 %v2340_v14, %v2339_v56 }
 0x239   :  { %v4735_v45 = vpop.f32.mrf.mxu0  ;;  %v2337_v28 = vmax.f32 %v1753_v53, 0.0  ;;  %v2335_v4 = vmax.f32 %v1745_v38, 0.0  ;;  %v3191_v47 = vcombine.high %v4767_v8, %v4767_v8 }
 0x23a   :  { %v4739_v27 = vpack.c.bf16 %v2352_v37, %v2351_v63 }
 0x23b   :  { %v4741_v25 = vpop.f32.mrf.mxu0  ;;  %3429 = vmatpush3.bf16.msra.mxu1 %v2524_v30  ;;  %v2528_v49 = vpack.c.bf16 %v2338_v6, %v2337_v28  ;;  %v2527_v9 = vpack.c.bf16 %v2336_v12, %v2335_v4  ;;  %v4772_v30 = vld [vmem:[%s4876_s3] ss:$0 sm:$0xff] }
 0x23c   :  { %3430 = vmatprep.subr.bf16.mxu1 %v2531_v21 }
 0x23d   :  { %v4745_v43 = vpop.f32.mrf.mxu0 }
 0x23f   :  { %v4749_v46 = vpop.f32.mrf.mxu0  ;;  %3431 = vmatpush3.bf16.msra.mxu1 %v2523_v5 }
 0x240   :  { %3432 = vmatprep.subr.bf16.mxu1 %v2530_v35 }
 0x241   :  { %v4753_v15 = vpop.f32.mrf.mxu0 }
 0x243   :  { %v3702_v57 = vpop.f32.mrf.mxu0  ;;  %3433 = vmatpush3.bf16.msra.mxu1 %v4639_v16 }
 0x244   :  { %3434 = vmatprep.subr.bf16.mxu1 %v2529_v39 }
 0x245   :  { %v1843_v58 = vpop.f32.mrf.mxu0 }
 0x247   :  { %v3705_v23 = vpop.f32.mrf.mxu0  ;;  %3435 = vmatpush3.bf16.msra.mxu1 %v4646_v0 }
 0x248   :  { %3436 = vmatprep.subr.bf16.mxu1 %v2528_v49  ;;  %v1865_v32 = vadd.f32 %v4397_v3, %v3705_v23  ;;  %v1852_v49 = vadd.f32 %v4772_v30, %v3702_v57  ;;  %v1849_v23 = vadd.f32 %v4772_v30, %v4749_v46 }
 0x249   :  { %v1856_v62 = vpop.f32.mrf.mxu0 }
 0x24a   :  { %v2365_v37 = vmax.f32 %v1865_v32, 0.0  ;;  %v1844_v32 = vadd.f32 %v4772_v30, %v1843_v58 }
 0x24b   :  { %v3706_v51 = vpop.f32.mrf.mxu0  ;;  %3437 = vmatpush3.bf16.msra.mxu1 %v4605_v61  ;;  %v3188_v61 = vcombine.low %v4671_v11, %v4671_v11 }
 0x24c   :  { %v1868_v16 = vadd.f32 %v4397_v3, %v3706_v51  ;;  %3438 = vmatprep.subr.bf16.mxu1 %v2527_v9  ;;  %v1857_v3 = vadd.f32 %v4772_v30, %v1856_v62 }
 0x24d   :  { %v1859_v63 = vpop.f32.mrf.mxu0 }
 0x24e   :  { %v2366_v0 = vmax.f32 %v1868_v16, 0.0  ;;  %v1860_v24 = vadd.f32 %v4772_v30, %v1859_v63  ;;  %v2363_v5 = vmax.f32 %v1857_v3, 0.0 }
 0x24f   :  { %v4778_v34 = vpop.f32.mrf.mxu0  ;;  %3439 = vmatpush3.bf16.msra.mxu1 %v4618_v2 }
 0x250   :  { %v2542_v21 = vpack.c.bf16 %v2366_v0, %v2365_v37  ;;  %3446 = vmatprep.subr.bf16.mxu1 %v4318_v22  ;;  %v2364_v17 = vmax.f32 %v1860_v24, 0.0  ;;  %v2361_v0 = vmax.f32 %v1849_v23, 0.0  ;;  %v1841_v24 = vadd.f32 %v4772_v30, %v4753_v15 }
 0x251   :  { %v4784_v20 = vpop.f32.mrf.mxu0 }
 0x252   :  { %2832 = vmatmul.mubr.bf16.vlgmr.msra.gmra.mxu1 %v3188_v61  ;;  %v3374_v50 = vpop.f32.mrf.mxu1  ;;  %v2541_v35 = vpack.c.bf16 %v2364_v17, %v2363_v5  ;;  %v2360_v17 = vmax.f32 %v1844_v32, 0.0 }
 0x253   :  { %v3710_v26 = vpop.f32.mrf.mxu0  ;;  %3447 = vmatpush3.bf16.msra.mxu1 %v2542_v21  ;;  %2871 = vmatprep.mubr.bf16.mxu1 %v3191_v47  ;;  %v1836_v21 = vadd.f32 %v4772_v30, %v4741_v25  ;;  %v1828_v25 = vadd.f32 %v4772_v30, %v4745_v43 }
 0x254   :  { %3448 = vmatprep.subr.bf16.mxu1 %v4320_v44  ;;  %v3375_v11 = vpop.f32.mrf.mxu1 }
 0x255   :  { %v1875_v2 = vpop.f32.mrf.mxu0  ;;  %v3376_v14 = vadd.f32 %v3375_v11, %v3374_v50  ;;  %v2356_v23 = vmax.f32 %v1828_v25, 0.0 }
 0x256   :  { %v3377_v53 = vpop.f32.mrf.mxu1  ;;  %v1876_v43 = vadd.f32 %v4772_v30, %v1875_v2  ;;  %v2453_v2 = vld [vmem:[%s4874_s1 + $0x30] sm:$0xff] }
 0x257   :  { %v3713_v56 = vpop.f32.mrf.mxu0  ;;  %3449 = vmatpush3.bf16.msra.mxu1 %v2541_v35  ;;  %v4788_v22 = vadd.f32 %v3376_v14, %v4698_v41  ;;  %v2362_v41 = vmax.f32 %v1852_v49, 0.0  ;;  %v1833_v35 = vadd.f32 %v4772_v30, %v4731_v31  ;;  %v2359_v14 = vmax.f32 %v1841_v24, 0.0  ;;  %v4911_v24 = vld [vmem:[#allocation15_spill] sm:$0xff] }
 0x258   :  { %v3378_v6 = vpop.f32.mrf.mxu1  ;;  %v1897_v46 = vadd.f32 %v4772_v30, %v3713_v56  ;;  %v2358_v56 = vmax.f32 %v1836_v21, 0.0  ;;  %v1881_v31 = vadd.f32 %v4772_v30, %v4778_v34 }
 0x259   :  { %v1888_v36 = vpop.f32.mrf.mxu0  ;;  %v2540_v58 = vpack.c.bf16 %v2362_v41, %v2361_v0  ;;  %v2539_v6 = vpack.c.bf16 %v2360_v17, %v2359_v14  ;;  %v2357_v49 = vmax.f32 %v1833_v35, 0.0  ;;  %v1873_v41 = vadd.f32 %v4772_v30, %v4784_v20  ;;  %v4906_v20 = vld [vmem:[#allocation23_spill] sm:$0xff]  ;;  %v4910_v0 = vld [vmem:[#allocation21_spill] sm:$0xff] }
 0x25a   :  { %v2373_v15 = vmax.f32 %v1897_v46, 0.0  ;;  %v1889_v53 = vadd.f32 %v4772_v30, %v1888_v36  ;;  %v4914_v46 = vld [vmem:[#allocation19_spill] sm:$0xff]  ;;  %v4020_v35 = vmov 0.0  }
 0x25b   :  { %v3714_v39 = vpop.f32.mrf.mxu0  ;;  %v2538_v36 = vpack.c.bf16 %v2358_v56, %v2357_v49  ;;  %v2367_v34 = vmax.f32 %v1873_v41, 0.0  ;;  %v3970_v14 = vld [vmem:[%s4877_s4] sm:$0xff]  }
 0x25c   :  { %v1900_v16 = vadd.f32 %v4772_v30, %v3714_v39  ;;  %v1884_v39 = vadd.f32 %v4772_v30, %v3710_v26  ;;  %v2369_v26 = vmax.f32 %v1881_v31, 0.0 }
 0x25d   :  { %v1891_v28 = vpop.f32.mrf.mxu0 }
 0x25e   :  { %v2374_v50 = vmax.f32 %v1900_v16, 0.0  ;;  %v1892_v5 = vadd.f32 %v4772_v30, %v1891_v28 }
 0x25f   :  { %v3717_v38 = vpop.f32.mrf.mxu0 }
 0x260   :  { %v1913_v44 = vadd.f32 %v4772_v30, %v3717_v38  ;;  %v2546_v38 = vpack.c.bf16 %v2374_v50, %v2373_v15  ;;  %v2372_v28 = vmax.f32 %v1892_v5, 0.0 }
 0x261   :  { %v1904_v12 = vpop.f32.mrf.mxu0 }
 0x262   :  { %v1905_v62 = vadd.f32 %v4772_v30, %v1904_v12  ;;  %v2377_v63 = vmax.f32 %v1913_v44, 0.0  ;;  %v1825_v12 = vadd.f32 %v4772_v30, %v4735_v45  ;;  %v2371_v44 = vmax.f32 %v1889_v53, 0.0 }
 0x263   :  { %v3718_v4 = vpop.f32.mrf.mxu0 }
 0x264   :  { %v1916_v9 = vadd.f32 %v4772_v30, %v3718_v4  ;;  %v2375_v61 = vmax.f32 %v1905_v62, 0.0  ;;  %v2370_v4 = vmax.f32 %v1884_v39, 0.0  ;;  %v2545_v62 = vpack.c.bf16 %v2372_v28, %v2371_v44 }
 0x265   :  { %v1907_v51 = vpop.f32.mrf.mxu0 }
 0x266   :  { %v2378_v37 = vmax.f32 %v1916_v9, 0.0  ;;  %v1908_v57 = vadd.f32 %v4772_v30, %v1907_v51  ;;  %v2355_v9 = vmax.f32 %v1825_v12, 0.0  ;;  %v2544_v32 = vpack.c.bf16 %v2370_v4, %v2369_v26 }
 0x267   :  { %v2368_v51 = vmax.f32 %v1876_v43, 0.0  ;;  %v3193_v30 = vcombine.high %v2453_v2, %v2453_v2 }
 0x268   :  { %v2548_v3 = vpack.c.bf16 %v2378_v37, %v2377_v63  ;;  %v2376_v47 = vmax.f32 %v1908_v57, 0.0  ;;  %v2537_v45 = vpack.c.bf16 %v2356_v23, %v2355_v9  ;;  %v3190_v63 = vcombine.low %v4767_v8, %v4767_v8  ;;  %v4908_v37 = vld [vmem:[#allocation24_spill] sm:$0xff]  ;;  %v4909_v57 = vld [vmem:[#allocation18_spill] sm:$0xff] }
 0x269   :  { %v2543_v16 = vpack.c.bf16 %v2368_v51, %v2367_v34 }
 0x26a   :  { %v2547_v11 = vpack.c.bf16 %v2376_v47, %v2375_v61  ;;  %3450 = vmatprep.subr.bf16.mxu1 %v2548_v3  ;;  %v4917_v3 = vld [vmem:[#allocation14_spill] sm:$0xff] }
 0x26b   :  { %3451 = vmatpush3.bf16.msra.mxu1 %v2540_v58 }
 0x26c   :  { %3452 = vmatprep.subr.bf16.mxu1 %v2547_v11  ;;  %v3969_v11 = vld [vmem:[%s4877_s4 + $0x8] sm:$0xff]  }
 0x26f   :  { %3453 = vmatpush3.bf16.msra.mxu1 %v2539_v6 }
 0x270   :  { %3454 = vmatprep.subr.bf16.mxu1 %v2546_v38 }
 0x273   :  { %3455 = vmatpush3.bf16.msra.mxu1 %v2538_v36 }
 0x274   :  { %3456 = vmatprep.subr.bf16.mxu1 %v2545_v62 }
 0x277   :  { %3457 = vmatpush3.bf16.msra.mxu1 %v2537_v45 }
 0x278   :  { %3458 = vmatprep.subr.bf16.mxu1 %v2544_v32 }
 0x27b   :  { %3459 = vmatpush3.bf16.msra.mxu1 %v4733_v1 }
 0x27c   :  { %3460 = vmatprep.subr.bf16.mxu1 %v2543_v16 }
 0x27f   :  { %3461 = vmatpush3.bf16.msra.mxu1 %v4739_v27  ;;  %v4901_v27 = vld [vmem:[#allocation10_spill] sm:$0xff] }
 0x280   :  { %3468 = vmatprep.subr.bf16.mxu1 %v4511_v29 }
 0x282   :  { %2872 = vmatmul.mubr.bf16.vlgmr.msra.gmra.mxu1 %v3190_v63 }
 0x283   :  { %3469 = vmatpush3.bf16.msra.mxu1 %v4412_v48  ;;  %2911 = vmatprep.mubr.bf16.mxu1 %v3193_v30 }
 0x284   :  { %3470 = vmatprep.subr.bf16.mxu1 %v4513_v40 }
 0x287   :  { %3471 = vmatpush3.bf16.msra.mxu1 %v4416_v13 }
 0x288   :  { %3472 = vmatprep.subr.bf16.mxu1 %v4495_v60  ;;  %v4902_v60 = vld [vmem:[#allocation11_spill] sm:$0xff] }
 0x28b   :  { %3473 = vmatpush3.bf16.msra.mxu1 %v4384_v10 }
 0x28c   :  { %3474 = vmatprep.subr.bf16.mxu1 %v4497_v33  ;;  %v4903_v33 = vld [vmem:[#allocation8_spill] sm:$0xff] }
 0x28f   :  { %3475 = vmatpush3.bf16.msra.mxu1 %v4386_v54  ;;  %v4904_v54 = vld [vmem:[#allocation12_spill] sm:$0xff] }
 0x290   :  { %3476 = vmatprep.subr.bf16.mxu1 %v4468_v42  ;;  %v3192_v42 = vcombine.low %v2453_v2, %v2453_v2  ;;  %v3196_v2 = vld [vmem:[%s4878_s5] ss:$0 sm:$0xff] }
 0x292   :  { %v3396_v1 = vpop.f32.mrf.mxu1 }
 0x293   :  { %3477 = vmatpush3.bf16.msra.mxu1 %v4358_v7  ;;  %v2454_v7 = vld [vmem:[%s4874_s1 + $0x38] sm:$0xff] }
 0x294   :  { %3478 = vmatprep.subr.bf16.mxu1 %v4470_v59  ;;  %v3397_v48 = vpop.f32.mrf.mxu1  ;;  %v4905_v59 = vld [vmem:[#allocation9_spill] sm:$0xff]  ;;  %v3195_v8 = vcombine.high %v2454_v7, %v2454_v7  ;;  %v3194_v61 = vcombine.low %v2454_v7, %v2454_v7 }
 0x295   :  { %v3398_v29 = vadd.f32 %v3397_v48, %v3396_v1 }
 0x296   :  { %v3399_v40 = vpop.f32.mrf.mxu1 }
 0x297   :  { %3479 = vmatpush3.bf16.msra.mxu1 %v4901_v27  ;;  %v2754_v13 = vadd.f32 %v3398_v29, %v4788_v22  ;;  %v4907_v22 = vld [vmem:[#allocation17_spill] sm:$0xff] }
 0x298   :  { %3480 = vmatprep.subr.bf16.mxu1 %v4902_v60  ;;  %v3400_v10 = vpop.f32.mrf.mxu1 }
 0x29b   :  { %3481 = vmatpush3.bf16.msra.mxu1 %v4903_v33 }
 0x29c   :  { %3482 = vmatprep.subr.bf16.mxu1 %v4904_v54 }
 0x29f   :  { %3483 = vmatpush3.bf16.msra.mxu1 %v4905_v59 }
 0x2a0   :  { %3490 = vmatprep.subr.bf16.mxu1 %v4694_v55  ;;  %v4912_v55 = vld [vmem:[#allocation22_spill] sm:$0xff] }
 0x2a2   :  { %2912 = vmatmul.mubr.bf16.vlgmr.msra.gmra.mxu1 %v3192_v42 }
 0x2a3   :  { %3491 = vmatpush3.bf16.msra.mxu1 %v4597_v19  ;;  %2951 = vmatprep.mubr.bf16.mxu1 %v3195_v8  ;;  %v4913_v19 = vld [vmem:[#allocation16_spill] sm:$0xff] }
 0x2a4   :  { %3492 = vmatprep.subr.bf16.mxu1 %v4696_v52  ;;  %v4915_v52 = vld [vmem:[#allocation13_spill] sm:$0xff] }
 0x2a7   :  { %3493 = vmatpush3.bf16.msra.mxu1 %v4600_v18  ;;  %v4916_v18 = vld [vmem:[#allocation20_spill] sm:$0xff] }
 0x2a8   :  { %3494 = vmatprep.subr.bf16.mxu1 %v4906_v20 }
 0x2ab   :  { %3495 = vmatpush3.bf16.msra.mxu1 %v4907_v22 }
 0x2ac   :  { %3496 = vmatprep.subr.bf16.mxu1 %v4908_v37 }
 0x2af   :  { %3497 = vmatpush3.bf16.msra.mxu1 %v4909_v57 }
 0x2b0   :  { %3498 = vmatprep.subr.bf16.mxu1 %v4910_v0 }
 0x2b3   :  { %3499 = vmatpush3.bf16.msra.mxu1 %v4911_v24 }
 0x2b4   :  { %3500 = vmatprep.subr.bf16.mxu1 %v4912_v55 }
 0x2b7   :  { %3501 = vmatpush3.bf16.msra.mxu1 %v4913_v19 }
 0x2b8   :  { %3502 = vmatprep.subr.bf16.mxu1 %v4914_v46 }
 0x2bb   :  { %3503 = vmatpush3.bf16.msra.mxu1 %v4915_v52 }
 0x2bc   :  { %3504 = vmatprep.subr.bf16.mxu1 %v4916_v18 }
 0x2bf   :  { %3505 = vmatpush3.bf16.msra.mxu1 %v4917_v3 }
 0x2c0   :  { %3787 = vmatprep.subr.bf16.mxu1 %v4020_v35 }
 0x2c2   :  { %2952 = vmatmul.mubr.bf16.vlgmr.msra.gmra.mxu1 %v3194_v61 }
 0x2c3   :  { %3788 = vmatpush3.bf16.msra.mxu1 %v3969_v11  ;;  %3791 = vmatprep.mubr.msk.bf16.mxu1 %vm4021_vm0, %v4020_v35 }
 0x2c4   :  { %3789 = vmatprep.subr.bf16.mxu1 %v4020_v35 }
 0x2c7   :  { %3790 = vmatpush3.bf16.msra.mxu1 %v3970_v14 }
 0x2d2   :  { %v3418_v47 = vpop.f32.mrf.mxu1 }
 0x2d4   :  { %v3419_v21 = vpop.f32.mrf.mxu1 }
 0x2d5   :  { %v3420_v58 = vadd.f32 %v3419_v21, %v3418_v47 }
 0x2d6   :  { %v3421_v17 = vpop.f32.mrf.mxu1 }
 0x2d7   :  { %v2794_v50 = vadd.f32 %v3420_v58, %v2754_v13 }
 0x2d8   :  { %v3422_v5 = vpop.f32.mrf.mxu1 }
 0x312   :  { %v3440_v15 = vpop.f32.mrf.mxu1 }
 0x314   :  { %v3441_v53 = vpop.f32.mrf.mxu1 }
 0x315   :  { %v3442_v56 = vadd.f32 %v3441_v53, %v3440_v15 }
 0x316   :  { %v3443_v25 = vpop.f32.mrf.mxu1 }
 0x317   :  { %v2834_v6 = vadd.f32 %v3442_v56, %v2794_v50 }
 0x318   :  { %v3444_v39 = vpop.f32.mrf.mxu1 }
 0x342   :  { %v3462_v38 = vpop.f32.mrf.mxu1 }
 0x344   :  { %v3463_v28 = vpop.f32.mrf.mxu1 }
 0x345   :  { %v3464_v4 = vadd.f32 %v3463_v28, %v3462_v38 }
 0x346   :  { %v3465_v49 = vpop.f32.mrf.mxu1 }
 0x347   :  { %v2874_v9 = vadd.f32 %v3464_v4, %v2834_v6 }
 0x348   :  { %v3466_v12 = vpop.f32.mrf.mxu1 }
 0x362   :  { %v3484_v31 = vpop.f32.mrf.mxu1 }
 0x364   :  { %v3485_v44 = vpop.f32.mrf.mxu1 }
 0x365   :  { %v3486_v43 = vadd.f32 %v3485_v44, %v3484_v31 }
 0x366   :  { %v3487_v36 = vpop.f32.mrf.mxu1 }
 0x367   :  { %v2914_v41 = vadd.f32 %v3486_v43, %v2874_v9 }
 0x368   :  { %v3488_v23 = vpop.f32.mrf.mxu1 }
 0x382   :  { %v3506_v62 = vpop.f32.mrf.mxu1 }
 0x384   :  { %v3507_v26 = vpop.f32.mrf.mxu1 }
 0x385   :  { %v3508_v45 = vadd.f32 %v3507_v26, %v3506_v62 }
 0x386   :  { %v3509_v32 = vpop.f32.mrf.mxu1 }
 0x387   :  { %v2954_v51 = vadd.f32 %v3508_v45, %v2914_v41 }
 0x388   :  { %v3510_v34 = vpop.f32.mrf.mxu1 }
 0x389   :  { %v2959_v16 = vpack.c.bf16 %v2954_v51, %v2954_v51 }
 0x38b   :  { %3792 = vmatmul.mubr.msk.bf16.vlgmr.msra.gmra.mxu1 %vm2983_vm1, %v2959_v16 }
 0x44b   :  { %v3021_v63 = vpop.f32.mrf.mxu1 }
 0x44c   :  { %v3022_v30 = vadd.f32 %v3196_v2, %v3021_v63 }
 0x44d   :  { %v3793_v1 = vpop.f32.mrf.mxu1 }
 0x44e   :  { %3027 = vst [vmem:[#allocation5] sm:$0xff] %v3022_v30 }
 0x44f   :  { %v3024_v48 = vpop.f32.mrf.mxu1 }
 0x450   :  { %4004 = shalt.err (!%p4001_p9)
}
 0x451   :  { %3037 = dma.vmem_to_hbm [thread:$0]  %s3035_s2, 128, %s4879_s6, [#allocation4]   ;;  %v3794_v29 = vpop.f32.mrf.mxu1 }
 0x452   :  { %4015 = dma.done.wait [#allocation4], 128  }
 0x453   :  { %4016 = vsyncadd [#allocation4], 4294967168 }
 0x454   :  { %3041 = vsyncpa [#allocation3], 1 }
 0x455   :  { %3042 = vsyncpa [#allocation4], 1 }

</bundles_post_ra>
